<compile_context>
chip_gen: v7x
topology: tpu7x:2x2x1
jax: 0.10.0
libtpu: 0.0.40
codegen_flags: <defaults>
</compile_context>

<pallas_src>
import jax
import jax.numpy as jnp
from jax.experimental import pallas as pl
from jax.experimental.pallas import tpu as pltpu

# --- module hyperparameters (consistent with the PyTorch module) ---
EMB_DIMS = 384                 # as in gpt.py
HIDDEN = EMB_DIMS * 4          # 1536
BATCH = 2
TIMESTEPS = 16                 # small sequence length for the demo
DROPOUT_PCT = 0.2              # unused at inference (identity)


def _ffn_kernel(x_ref, w1_ref, b1_ref, w2_ref, b2_ref, o_ref):
    """Fused FeedForward for one (tm, C) row slab.

    x_ref  : (tm, C)  f32
    w1_ref : (C, 4C)  bf16     b1_ref : (1, 4C) f32
    w2_ref : (4C, C)  bf16     b2_ref : (1, C)  f32
    o_ref  : (tm, C)  f32
    """
    # Linear1 — bf16 MXU matmul with f32 accumulation.
    x = x_ref[...].astype(jnp.bfloat16)                               # (tm, C)
    h = jnp.dot(x, w1_ref[...], preferred_element_type=jnp.float32)   # (tm, 4C)
    # Bias + ReLU epilogue in f32 (VPU-safe on all generations).
    h = jnp.maximum(h + b1_ref[...], 0.0)

    # Linear2 — feed the MXU bf16, accumulate f32.
    h = h.astype(jnp.bfloat16)
    out = jnp.dot(h, w2_ref[...], preferred_element_type=jnp.float32)  # (tm, C)
    out = out + b2_ref[...]

    # Dropout == identity in eval mode.
    # TODO(synk): training-mode dropout (PRNG mask * 1/(1-p)).
    o_ref[...] = out.astype(o_ref.dtype)


def feed_forward(x, w1, b1, w2, b2):
    """x: (B, T, C); w1: (C, 4C); b1: (1, 4C); w2: (4C, C); b2: (1, C)."""
    B, T, C = x.shape
    H = w1.shape[1]
    assert w1.shape == (C, H) and w2.shape == (H, C)
    assert b1.shape == (1, H) and b2.shape == (1, C)
    assert C % 128 == 0 and H % 128 == 0   # lane-dense matmuls / stores

    M = B * T
    x2 = x.reshape(M, C)                   # flatten batch*time into matmul M dim

    # bf16 weights: halves the dominant weight-DMA bytes; accumulation stays f32.
    w1b = w1.astype(jnp.bfloat16)
    w2b = w2.astype(jnp.bfloat16)

    # Single grid step when M is small (demo: M=32 -> grid=(1,)); row-tiled
    # grid with resident weights only when M is large enough to reuse them.
    if M <= 512:
        tm = M
    else:
        tm = 256
        assert M % tm == 0   # TODO(synk): mask the ragged final tile for arbitrary M.
    num_tiles = M // tm
    assert tm % 8 == 0

    # Avoid megacore-sharding a tiny grid on v7x (it duplicates the resident
    # weights per TensorCore on a weight-DMA-bound kernel).
    semantics = ("arbitrary",) if num_tiles <= 2 else ("parallel",)

    itemsize = jnp.dtype(x.dtype).itemsize
    cost = pl.CostEstimate(
        flops=4 * M * C * H,                       # two (M,C)x(C,4C)-class matmuls
        transcendentals=0,
        bytes_accessed=(2 * M * C * itemsize       # x in + out
                        + 2 * C * H * 2            # bf16 W1 + W2
                        + (H + C) * 4),            # f32 biases
    )

    out = pl.pallas_call(
        _ffn_kernel,
        out_shape=jax.ShapeDtypeStruct((M, C), x.dtype),
        grid_spec=pltpu.PrefetchScalarGridSpec(
            num_scalar_prefetch=0,
            grid=(num_tiles,),
            in_specs=[
                pl.BlockSpec((tm, C), lambda i: (i, 0)),   # x rows for tile i
                pl.BlockSpec((C, H), lambda i: (0, 0)),    # W1 (resident, bf16)
                pl.BlockSpec((1, H), lambda i: (0, 0)),    # b1
                pl.BlockSpec((H, C), lambda i: (0, 0)),    # W2 (resident, bf16)
                pl.BlockSpec((1, C), lambda i: (0, 0)),    # b2
            ],
            out_specs=pl.BlockSpec((tm, C), lambda i: (i, 0)),
        ),
        compiler_params=pltpu.CompilerParams(dimension_semantics=semantics),
        cost_estimate=cost,
    )(x2, w1b, b1, w2b, b2)

    return out.reshape(B, T, C)


def _reference_bf16(x, w1, b1, w2, b2):
    """Pure-JAX reference mirroring the kernel's bf16-weight arithmetic."""
    xb = x.astype(jnp.bfloat16)
    w1b = w1.astype(jnp.bfloat16)
    w2b = w2.astype(jnp.bfloat16)
    h = jnp.dot(xb, w1b, preferred_element_type=jnp.float32) + b1[0]
    h = jnp.maximum(h, 0.0).astype(jnp.bfloat16)
    return jnp.dot(h, w2b, preferred_element_type=jnp.float32) + b2[0]


def _reference_f32(x, w1, b1, w2, b2):
    """Full-precision reference of the PyTorch forward (dropout = identity)."""
    h = jnp.maximum(x @ w1 + b1[0], 0.0)
    return h @ w2 + b2[0]


if __name__ == "__main__":
    key = jax.random.PRNGKey(0)
    kx, k1, kb1, k2, kb2 = jax.random.split(key, 5)

    # deterministic synthetic parameters (no checkpoint load)
    x = jax.random.normal(kx, (BATCH, TIMESTEPS, EMB_DIMS), dtype=jnp.float32)
    w1 = jax.random.normal(k1, (EMB_DIMS, HIDDEN), jnp.float32) * 0.05
    b1 = jax.random.normal(kb1, (1, HIDDEN), jnp.float32) * 0.05
    w2 = jax.random.normal(k2, (HIDDEN, EMB_DIMS), jnp.float32) * 0.05
    b2 = jax.random.normal(kb2, (1, EMB_DIMS), jnp.float32) * 0.05

    out = feed_forward(x, w1, b1, w2, b2)
    out = jax.block_until_ready(out)
    assert out.shape == (BATCH, TIMESTEPS, EMB_DIMS)

    # Exact-arithmetic check (same bf16 cast points as the kernel).
    ref_bf16 = _reference_bf16(x, w1, b1, w2, b2)
    assert jnp.allclose(out, ref_bf16, atol=2e-3, rtol=2e-3), \
        "mismatch vs bf16-mirrored reference"

    # Loose sanity check against the full f32 math of the PyTorch module
    # (difference is only the bf16 weight/activation quantization).
    ref_f32 = _reference_f32(x, w1, b1, w2, b2)
    assert jnp.allclose(out, ref_f32, atol=1e-1, rtol=1e-1), \
        "mismatch vs f32 reference beyond bf16 quantization budget"

    print("KERNEL_OK")
</pallas_src>

<mosaic_0001>
module attributes {stable_mosaic.version = 11 : i64} {
  func.func @_ffn_kernel(%arg0: i32, %arg1: memref<32x384xf32, #tpu.memory_space<vmem>>, %arg2: memref<384x1536xbf16, #tpu.memory_space<vmem>>, %arg3: memref<1x1536xf32, #tpu.memory_space<vmem>>, %arg4: memref<1536x384xbf16, #tpu.memory_space<vmem>>, %arg5: memref<1x384xf32, #tpu.memory_space<vmem>>, %arg6: memref<32x384xf32, #tpu.memory_space<vmem>>) attributes {dimension_semantics = [#tpu.dimension_semantics<arbitrary>], iteration_bounds = array<i64: 1>, scalar_prefetch = 0 : i64, scratch_operands = 0 : i64, tpu.core_type = #tpu.core_type<tc>, window_params = [{transform_indices = @transform_0, window_bounds = array<i64: 32, 384>}, {pipeline_mode = #tpu.pipeline_mode<synchronous>, transform_indices = @transform_1, window_bounds = array<i64: 384, 1536>}, {pipeline_mode = #tpu.pipeline_mode<synchronous>, transform_indices = @transform_2, window_bounds = array<i64: 1, 1536>}, {pipeline_mode = #tpu.pipeline_mode<synchronous>, transform_indices = @transform_3, window_bounds = array<i64: 1536, 384>}, {pipeline_mode = #tpu.pipeline_mode<synchronous>, transform_indices = @transform_4, window_bounds = array<i64: 1, 384>}, {transform_indices = @transform_5, window_bounds = array<i64: 32, 384>}]} {
    %c0 = arith.constant 0 : index
    %c0_0 = arith.constant 0 : index
    %0 = vector.load %arg1[%c0, %c0_0] : memref<32x384xf32, #tpu.memory_space<vmem>>, vector<32x384xf32>
    %1 = arith.truncf %0 : vector<32x384xf32> to vector<32x384xbf16>
    %c0_1 = arith.constant 0 : index
    %c0_2 = arith.constant 0 : index
    %2 = vector.load %arg2[%c0_1, %c0_2] : memref<384x1536xbf16, #tpu.memory_space<vmem>>, vector<384x1536xbf16>
    %cst = arith.constant dense<0.000000e+00> : vector<32x1536xf32>
    %3 = tpu.matmul %1, %2, %cst {dimension_numbers = #tpu.dot_dimension_numbers<[1], [0], [0], [1], [0, 0, 1, 1], [], []>} : vector<32x384xbf16>, vector<384x1536xbf16>, vector<32x1536xf32> -> vector<32x1536xf32>
    %c0_3 = arith.constant 0 : index
    %c0_4 = arith.constant 0 : index
    %4 = vector.load %arg3[%c0_3, %c0_4] : memref<1x1536xf32, #tpu.memory_space<vmem>>, vector<1x1536xf32>
    %5 = vector.broadcast %4 : vector<1x1536xf32> to vector<32x1536xf32>
    %6 = arith.addf %3, %5 : vector<32x1536xf32>
    %cst_5 = arith.constant 0.000000e+00 : f32
    %7 = vector.broadcast %cst_5 : f32 to vector<32x1536xf32>
    %8 = arith.maximumf %6, %7 : vector<32x1536xf32>
    %9 = arith.truncf %8 : vector<32x1536xf32> to vector<32x1536xbf16>
    %c0_6 = arith.constant 0 : index
    %c0_7 = arith.constant 0 : index
    %10 = vector.load %arg4[%c0_6, %c0_7] : memref<1536x384xbf16, #tpu.memory_space<vmem>>, vector<1536x384xbf16>
    %cst_8 = arith.constant dense<0.000000e+00> : vector<32x384xf32>
    %11 = tpu.matmul %9, %10, %cst_8 {dimension_numbers = #tpu.dot_dimension_numbers<[1], [0], [0], [1], [0, 0, 1, 1], [], []>} : vector<32x1536xbf16>, vector<1536x384xbf16>, vector<32x384xf32> -> vector<32x384xf32>
    %c0_9 = arith.constant 0 : index
    %c0_10 = arith.constant 0 : index
    %12 = vector.load %arg5[%c0_9, %c0_10] : memref<1x384xf32, #tpu.memory_space<vmem>>, vector<1x384xf32>
    %13 = vector.broadcast %12 : vector<1x384xf32> to vector<32x384xf32>
    %14 = arith.addf %11, %13 : vector<32x384xf32>
    %c0_11 = arith.constant 0 : index
    %c0_12 = arith.constant 0 : index
    %15 = vector.load %arg6[%c0_11, %c0_12] : memref<32x384xf32, #tpu.memory_space<vmem>>, vector<32x384xf32>
    tpu.vector_store %arg6[%c0_11, %c0_12], %14 {strides = array<i32>} : memref<32x384xf32, #tpu.memory_space<vmem>>, vector<32x384xf32>,
    return
  }
  func.func @transform_0(%arg0: i32) -> (i32, i32) {
    %c0_i32 = arith.constant 0 : i32
    %c0_i32_0 = arith.constant 0 : i32
    return %arg0, %c0_i32 : i32, i32
  }
  func.func @transform_1(%arg0: i32) -> (i32, i32) {
    %c0_i32 = arith.constant 0 : i32
    %c0_i32_0 = arith.constant 0 : i32
    %c0_i32_1 = arith.constant 0 : i32
    return %c0_i32, %c0_i32_0 : i32, i32
  }
  func.func @transform_2(%arg0: i32) -> (i32, i32) {
    %c0_i32 = arith.constant 0 : i32
    %c0_i32_0 = arith.constant 0 : i32
    %c0_i32_1 = arith.constant 0 : i32
    return %c0_i32, %c0_i32_0 : i32, i32
  }
  func.func @transform_3(%arg0: i32) -> (i32, i32) {
    %c0_i32 = arith.constant 0 : i32
    %c0_i32_0 = arith.constant 0 : i32
    %c0_i32_1 = arith.constant 0 : i32
    return %c0_i32, %c0_i32_0 : i32, i32
  }
  func.func @transform_4(%arg0: i32) -> (i32, i32) {
    %c0_i32 = arith.constant 0 : i32
    %c0_i32_0 = arith.constant 0 : i32
    %c0_i32_1 = arith.constant 0 : i32
    return %c0_i32, %c0_i32_0 : i32, i32
  }
  func.func @transform_5(%arg0: i32) -> (i32, i32) {
    %c0_i32 = arith.constant 0 : i32
    %c0_i32_0 = arith.constant 0 : i32
    return %arg0, %c0_i32 : i32, i32
  }
}

</mosaic_0001>

<bundles_post_ra>
// kernel: tpu_custom_call.1
= control target key start
LH: loop header
LB: loop body
LE: loop exit
PB: predicated region body
PF: predicated region fallthrough
CT: control target
= control target key end

     0   :  { %10 = vsyncpa [#allocation3], 0  ;;  %s7351_s0 = inlined_call_operand.hbm [shape: f32[32,384], index: 0, kind: input, shape index: {}]   ;;  %s7352_s1 = inlined_call_operand.hbm [shape: bf16[384,1536], index: 1, kind: input, shape index: {}]   ;;  %s7353_s2 = inlined_call_operand.hbm [shape: f32[1,1536], index: 2, kind: input, shape index: {}]   ;;  %s7354_s3 = inlined_call_operand.hbm [shape: bf16[1536,384], index: 3, kind: input, shape index: {}]   ;;  %s7355_s4 = inlined_call_operand.hbm [shape: f32[1,384], index: 4, kind: input, shape index: {}]   ;;  %s7356_s5 = inlined_call_operand.hbm [shape: f32[32,384], index: 5, kind: output, shape index: {}]  }
   0x1   :  { %11 = vsyncpa [#allocation6], 0 }
   0x2   :  { %12 = vsyncpa [#allocation9], 0 }
   0x3   :  { %13 = vsyncpa [#allocation4], 0  ;;  %s7042_s18 = smov [#allocation5]   ;;  %s6902_s22 = scalar_lea.hbm %s7352_s1, 36864 }
   0x4   :  { %s31_s19 = sshll.u32 %s7042_s18, 4  ;;  %p6903_p0 = scmp.ne.s32.totalorder %s7352_s1, %s6902_s22  ;;  %s32_s19 = int_to_ptr.vmem [resolvable:$true] %s31_s19 }
   0x5   :  { %p6906_p1 = scmp.lt.u32.totalorder %s6902_s22, %s7352_s1 }
   0x7   :  { %p6908_p2 = pnand %p6906_p1, %p6903_p0 }
   0x9   :  { %6911 = shalt.err (!%p6908_p2)
}
   0xa   :  { %s6912_s27 = scalar_lea.vmem %s32_s19, 36864  ;;  %p6917_p4 = scmp.lt.s32.totalorder %s32_s19, %s32_s19 }
   0xb   :  { %p6913_p3 = scmp.ne.s32.totalorder %s32_s19, %s6912_s27  ;;  %p6918_p5 = scmp.lt.s32.totalorder %s6912_s27, %s6912_s27 }
   0xd   :  { %p6919_p6 = por %p6918_p5, %p6917_p4 }
   0xf   :  { %p6920_p7 = pnand %p6919_p6, %p6913_p3 }
  0x11   :  { %6923 = shalt.err (!%p6920_p7)
}
  0x12   :  { %s7043_s28 = smov 768   ;;  %s7044_s29 = smov 48  }
  0x13   :  { %37 = dma.hbm_to_vmem [thread:$0]  %s7352_s1, 36864, %s32_s19, [#allocation6], %s7043_s28, %s7043_s28, %s7044_s29  }
  0x14   :  { %s7045_s7 = smov [#allocation8]   ;;  %s6924_s11 = scalar_lea.hbm %s7354_s3, 36864 }
  0x15   :  { %s53_s8 = sshll.u32 %s7045_s7, 4  ;;  %p6925_p8 = scmp.ne.s32.totalorder %s7354_s3, %s6924_s11  ;;  %s54_s8 = int_to_ptr.vmem [resolvable:$true] %s53_s8 }
  0x16   :  { %p6928_p9 = scmp.lt.u32.totalorder %s6924_s11, %s7354_s3 }
  0x18   :  { %p6930_p10 = pnand %p6928_p9, %p6925_p8 }
  0x1a   :  { %6933 = shalt.err (!%p6930_p10)
}
  0x1b   :  { %s6934_s16 = scalar_lea.vmem %s54_s8, 36864  ;;  %p6939_p12 = scmp.lt.s32.totalorder %s54_s8, %s54_s8 }
  0x1c   :  { %p6935_p11 = scmp.ne.s32.totalorder %s54_s8, %s6934_s16  ;;  %p6940_p13 = scmp.lt.s32.totalorder %s6934_s16, %s6934_s16 }
  0x1e   :  { %p6941_p0 = por %p6940_p13, %p6939_p12 }
  0x20   :  { %p6942_p1 = pnand %p6941_p0, %p6935_p11 }
  0x22   :  { %6945 = shalt.err (!%p6942_p1)
}
  0x23   :  { %s7046_s1 = smov 192   ;;  %s7047_s17 = smov 12  }
  0x24   :  { %59 = dma.hbm_to_vmem [thread:$0]  %s7354_s3, 36864, %s54_s8, [#allocation9], %s7046_s1, %s7046_s1, %s7047_s17  }
  0x25   :  { %s7048_s20 = smov [#allocation2]   ;;  %s6946_s24 = scalar_lea.hbm %s7351_s0, 1536 }
  0x26   :  { %s19_s21 = sshll.u32 %s7048_s20, 4  ;;  %p6947_p2 = scmp.ne.s32.totalorder %s7351_s0, %s6946_s24  ;;  %s20_s21 = int_to_ptr.vmem [resolvable:$true] %s19_s21 }
  0x27   :  { %p6950_p3 = scmp.lt.u32.totalorder %s6946_s24, %s7351_s0 }
  0x29   :  { %p6952_p4 = pnand %p6950_p3, %p6947_p2 }
  0x2b   :  { %6955 = shalt.err (!%p6952_p4)
}
  0x2c   :  { %s6956_s29 = scalar_lea.vmem %s20_s21, 1536  ;;  %p6961_p6 = scmp.lt.s32.totalorder %s20_s21, %s20_s21 }
  0x2d   :  { %p6957_p5 = scmp.ne.s32.totalorder %s20_s21, %s6956_s29  ;;  %p6962_p7 = scmp.lt.s32.totalorder %s6956_s29, %s6956_s29 }
  0x2f   :  { %p6963_p8 = por %p6962_p7, %p6961_p6 }
  0x31   :  { %p6964_p9 = pnand %p6963_p8, %p6957_p5 }
  0x33   :  { %6967 = shalt.err (!%p6964_p9)
}
  0x34   :  { %s7049_s3 = smov 384   ;;  %s7050_s30 = smov 24  }
  0x35   :  { %25 = dma.hbm_to_vmem [thread:$0]  %s7351_s0, 1536, %s20_s21, [#allocation3], %s7049_s3, %s7049_s3, %s7050_s30  }
  0x36   :  { %s7051_s8 = smov [#allocation7]   ;;  %s7052_s10 = smov [#allocation10]  }
  0x37   :  { %s44_s9 = sshll.u32 %s7051_s8, 4  ;;  %s66_s11 = sshll.u32 %s7052_s10, 4  ;;  %s45_s9 = int_to_ptr.vmem [resolvable:$true] %s44_s9  ;;  %s67_s11 = int_to_ptr.vmem [resolvable:$true] %s66_s11 }
  0x38   :  { %s6968_s14 = scalar_lea.hbm %s7353_s2, 192 }
  0x39   :  { %p6969_p10 = scmp.ne.s32.totalorder %s7353_s2, %s6968_s14  ;;  %p6972_p11 = scmp.lt.u32.totalorder %s6968_s14, %s7353_s2 }
  0x3b   :  { %p6974_p12 = pnand %p6972_p11, %p6969_p10 }
  0x3d   :  { %6977 = shalt.err (!%p6974_p12)
}
  0x3e   :  { %s6978_s0 = scalar_lea.vmem %s45_s9, 192  ;;  %p6983_p0 = scmp.lt.s32.totalorder %s45_s9, %s45_s9 }
  0x3f   :  { %p6979_p13 = scmp.ne.s32.totalorder %s45_s9, %s6978_s0  ;;  %p6984_p1 = scmp.lt.s32.totalorder %s6978_s0, %s6978_s0 }
  0x41   :  { %p6985_p2 = por %p6984_p1, %p6983_p0 }
  0x43   :  { %p6986_p3 = pnand %p6985_p2, %p6979_p13 }
  0x45   :  { %6989 = shalt.err (!%p6986_p3)
}
  0x46   :  { %47 = dma.hbm_to_vmem [thread:$0]  %s7353_s2, 192, %s45_s9, [#allocation6]  }
  0x47   :  { %s6990_s22 = scalar_lea.hbm %s7355_s4, 48 }
  0x48   :  { %p6991_p4 = scmp.ne.s32.totalorder %s7355_s4, %s6990_s22  ;;  %p6994_p5 = scmp.lt.u32.totalorder %s6990_s22, %s7355_s4 }
  0x4a   :  { %p6996_p6 = pnand %p6994_p5, %p6991_p4 }
  0x4c   :  { %6999 = shalt.err (!%p6996_p6)
}
  0x4d   :  { %s7000_s27 = scalar_lea.vmem %s67_s11, 48  ;;  %s7004_s28 = scalar_lea.vmem %s67_s11, 64 }
  0x4e   :  { %p7001_p7 = scmp.ne.s32.totalorder %s67_s11, %s7000_s27  ;;  %p7005_p8 = scmp.lt.s32.totalorder %s67_s11, %s67_s11 }
  0x4f   :  { %p7006_p9 = scmp.lt.s32.totalorder %s7004_s28, %s7000_s27 }
  0x51   :  { %p7007_p10 = por %p7006_p9, %p7005_p8 }
  0x53   :  { %p7008_p11 = pnand %p7007_p10, %p7001_p7 }
  0x55   :  { %7011 = shalt.err (!%p7008_p11)
}
  0x56   :  { %69 = dma.hbm_to_vmem [thread:$0]  %s7355_s4, 48, %s67_s11, [#allocation9]  }
  0x57   :  { %7034 = dma.done.wait [#allocation3], 1536  }
  0x58   :  { %7035 = vsyncadd [#allocation3], 4294965760 }
  0x59   :  { %7036 = dma.done.wait [#allocation6], 37056  }
  0x5a   :  { %7037 = vsyncadd [#allocation6], 4294930240 }
  0x5b   :  { %7038 = dma.done.wait [#allocation9], 36912  }
  0x5c   :  { %7039 = vsyncadd [#allocation9], 4294930384  ;;  %v6085_v0 = vld [vmem:[#allocation5 + $0x4] ss:$48 sps:$4 sm:$0xff]   ;;  %v6087_v1 = vld [vmem:[#allocation5] ss:$48 sps:$4 sm:$0xff]  }
  0x5d   :  { %1896 = vmatprep.subr.bf16.mxu1 %v6085_v0  ;;  %v6088_v2 = vld [vmem:[#allocation5 + $0x64] ss:$48 sps:$4 sm:$0xff]   ;;  %v6090_v3 = vld [vmem:[#allocation5 + $0x60] ss:$48 sps:$4 sm:$0xff]   ;;  %v87_v18 = vld [vmem:[#allocation2 + $0x8] sm:$0xff]  ;;  %s7054_s4 = smov [#allocation11]  }
  0x5e   :  { %1897 = vmatpush1.bf16.msra.mxu1 %v6087_v1  ;;  %v6091_v4 = vld [vmem:[#allocation5 + $0xc4] ss:$48 sps:$4 sm:$0xff]   ;;  %v6093_v5 = vld [vmem:[#allocation5 + $0xc0] ss:$48 sps:$4 sm:$0xff]   ;;  %v89_v58 = vld [vmem:[#allocation2 + $0x18] sm:$0xff]  ;;  %s5170_s6 = sshll.u32 %s7054_s4, 4  ;;  %s5171_s6 = int_to_ptr.vmem [resolvable:$true] %s5170_s6 }
  0x5f   :  { %1898 = vmatprep.subr.bf16.mxu1 %v6088_v2  ;;  %v6094_v6 = vld [vmem:[#allocation5 + $0x124] ss:$48 sps:$4 sm:$0xff]   ;;  %v6096_v7 = vld [vmem:[#allocation5 + $0x120] ss:$48 sps:$4 sm:$0xff]   ;;  %v93_v59 = vld [vmem:[#allocation2 + $0x38] sm:$0xff]  ;;  %s7012_s7 = scalar_lea.vmem %s5171_s6, 1536  ;;  %p7017_p13 = scmp.lt.s32.totalorder %s5171_s6, %s5171_s6 }
  0x60   :  { %v6097_v8 = vld [vmem:[#allocation5 + $0x184] ss:$48 sps:$4 sm:$0xff]   ;;  %v6099_v9 = vld [vmem:[#allocation5 + $0x180] ss:$48 sps:$4 sm:$0xff]   ;;  %p7013_p12 = scmp.ne.s32.totalorder %s5171_s6, %s7012_s7  ;;  %p7018_p0 = scmp.lt.s32.totalorder %s7012_s7, %s7012_s7 }
  0x61   :  { %v6100_v10 = vld [vmem:[#allocation5 + $0x1e4] ss:$48 sps:$4 sm:$0xff]   ;;  %v6102_v11 = vld [vmem:[#allocation5 + $0x1e0] ss:$48 sps:$4 sm:$0xff]  }
  0x62   :  { %1899 = vmatpush1.bf16.msra.mxu1 %v6090_v3  ;;  %v6103_v12 = vld [vmem:[#allocation5 + $0x244] ss:$48 sps:$4 sm:$0xff]   ;;  %v6105_v14 = vld [vmem:[#allocation5 + $0x240] ss:$48 sps:$4 sm:$0xff]   ;;  %p7019_p1 = por %p7018_p0, %p7017_p13 }
  0x63   :  { %1900 = vmatprep.subr.bf16.mxu1 %v6091_v4  ;;  %v6130_v13 = vld [vmem:[#allocation5 + $0x14] ss:$48 sps:$4 sm:$0xff]   ;;  %v6134_v16 = vld [vmem:[#allocation5 + $0x10] ss:$48 sps:$4 sm:$0xff]  }
  0x64   :  { %v6106_v15 = vld [vmem:[#allocation5 + $0x2a4] ss:$48 sps:$4 sm:$0xff]   ;;  %2108 = vmatprep.subr.bf16.mxu0 %v6130_v13  ;;  %v6141_v21 = vld [vmem:[#allocation5 + $0x70] ss:$48 sps:$4 sm:$0xff]   ;;  %p7020_p2 = pnand %p7019_p1, %p7013_p12 }
  0x65   :  { %v6136_v17 = vld [vmem:[#allocation5 + $0x74] ss:$48 sps:$4 sm:$0xff]   ;;  %2109 = vmatpush1.bf16.msra.mxu0 %v6134_v16  ;;  %v6108_v22 = vld [vmem:[#allocation5 + $0x2a0] ss:$48 sps:$4 sm:$0xff]  }
  0x66   :  { %1901 = vmatpush1.bf16.msra.mxu1 %v6093_v5  ;;  %v90_v19 = vld [vmem:[#allocation2 + $0x20] sm:$0xff]  ;;  %2110 = vmatprep.subr.bf16.mxu0 %v6136_v17  ;;  %v96_v60 = vld [vmem:[#allocation2 + $0x50] sm:$0xff] }
  0x67   :  { %1902 = vmatprep.subr.bf16.mxu1 %v6094_v6  ;;  %v7148_v20 = vpack.c.bf16 %v90_v19, %v87_v18  ;;  %v6142_v23 = vld [vmem:[#allocation5 + $0xd4] ss:$48 sps:$4 sm:$0xff]   ;;  %v6147_v25 = vld [vmem:[#allocation5 + $0xd0] ss:$48 sps:$4 sm:$0xff]   ;;  %v7154_v2 = vpack.c.bf16 %v96_v60, %v93_v59  ;;  %v7053_v18 = vmov 0  }
  0x68   :  { %v6109_v24 = vld [vmem:[#allocation5 + $0x304] ss:$48 sps:$4 sm:$0xff]   ;;  %v6111_v27 = vld [vmem:[#allocation5 + $0x300] ss:$48 sps:$4 sm:$0xff]   ;;  %v6210_v60 = vld [vmem:[#allocation5 + $0x188] ss:$48 sps:$4 sm:$0xff]  }
  0x69   :  { %1928 = vmatprep.mubr.bf16.mxu1 %v7148_v20  ;;  %2111 = vmatpush1.bf16.msra.mxu0 %v6141_v21  ;;  %v6148_v26 = vld [vmem:[#allocation5 + $0x134] ss:$48 sps:$4 sm:$0xff]   ;;  %v6153_v29 = vld [vmem:[#allocation5 + $0x130] ss:$48 sps:$4 sm:$0xff]  }
  0x6a   :  { %1903 = vmatpush1.bf16.msra.mxu1 %v6096_v7  ;;  %2112 = vmatprep.subr.bf16.mxu0 %v6142_v23  ;;  %v6112_v28 = vld [vmem:[#allocation5 + $0x364] ss:$48 sps:$4 sm:$0xff]   ;;  %v6114_v31 = vld [vmem:[#allocation5 + $0x360] ss:$48 sps:$4 sm:$0xff]  }
  0x6b   :  { %1904 = vmatprep.subr.bf16.mxu1 %v6097_v8  ;;  %2140 = vmatprep.mubr.bf16.mxu0 %v7148_v20  ;;  %v6154_v30 = vld [vmem:[#allocation5 + $0x194] ss:$48 sps:$4 sm:$0xff]   ;;  %v6159_v33 = vld [vmem:[#allocation5 + $0x190] ss:$48 sps:$4 sm:$0xff]   ;;  %v95_v8 = vld [vmem:[#allocation2 + $0x48] sm:$0xff] }
  0x6c   :  { %v6115_v32 = vld [vmem:[#allocation5 + $0x3c4] ss:$48 sps:$4 sm:$0xff]   ;;  %v6117_v35 = vld [vmem:[#allocation5 + $0x3c0] ss:$48 sps:$4 sm:$0xff]  }
  0x6d   :  { %2113 = vmatpush1.bf16.msra.mxu0 %v6147_v25  ;;  %v6160_v34 = vld [vmem:[#allocation5 + $0x1f4] ss:$48 sps:$4 sm:$0xff]   ;;  %v6165_v37 = vld [vmem:[#allocation5 + $0x1f0] ss:$48 sps:$4 sm:$0xff]  }
  0x6e   :  { %1905 = vmatpush1.bf16.msra.mxu1 %v6099_v9  ;;  %2114 = vmatprep.subr.bf16.mxu0 %v6148_v26  ;;  %v6118_v36 = vld [vmem:[#allocation5 + $0x424] ss:$48 sps:$4 sm:$0xff]   ;;  %v6120_v39 = vld [vmem:[#allocation5 + $0x420] ss:$48 sps:$4 sm:$0xff]  }
  0x6f   :  { %1906 = vmatprep.subr.bf16.mxu1 %v6100_v10  ;;  %v6166_v38 = vld [vmem:[#allocation5 + $0x254] ss:$48 sps:$4 sm:$0xff]   ;;  %v6171_v41 = vld [vmem:[#allocation5 + $0x250] ss:$48 sps:$4 sm:$0xff]  }
  0x70   :  { %v6121_v40 = vld [vmem:[#allocation5 + $0x484] ss:$48 sps:$4 sm:$0xff]   ;;  %v6123_v43 = vld [vmem:[#allocation5 + $0x480] ss:$48 sps:$4 sm:$0xff]  }
  0x71   :  { %2115 = vmatpush1.bf16.msra.mxu0 %v6153_v29  ;;  %v6172_v42 = vld [vmem:[#allocation5 + $0x2b4] ss:$48 sps:$4 sm:$0xff]   ;;  %v6177_v45 = vld [vmem:[#allocation5 + $0x2b0] ss:$48 sps:$4 sm:$0xff]  }
  0x72   :  { %1907 = vmatpush1.bf16.msra.mxu1 %v6102_v11  ;;  %2116 = vmatprep.subr.bf16.mxu0 %v6154_v30  ;;  %v6124_v44 = vld [vmem:[#allocation5 + $0x4e4] ss:$48 sps:$4 sm:$0xff]   ;;  %v6126_v47 = vld [vmem:[#allocation5 + $0x4e0] ss:$48 sps:$4 sm:$0xff]  }
  0x73   :  { %1908 = vmatprep.subr.bf16.mxu1 %v6103_v12  ;;  %v6178_v46 = vld [vmem:[#allocation5 + $0x314] ss:$48 sps:$4 sm:$0xff]   ;;  %v6183_v49 = vld [vmem:[#allocation5 + $0x310] ss:$48 sps:$4 sm:$0xff]  }
  0x74   :  { %v6127_v48 = vld [vmem:[#allocation5 + $0x544] ss:$48 sps:$4 sm:$0xff]   ;;  %v6129_v51 = vld [vmem:[#allocation5 + $0x540] ss:$48 sps:$4 sm:$0xff]  }
  0x75   :  { %2117 = vmatpush1.bf16.msra.mxu0 %v6159_v33  ;;  %v6184_v50 = vld [vmem:[#allocation5 + $0x374] ss:$48 sps:$4 sm:$0xff]   ;;  %v6189_v53 = vld [vmem:[#allocation5 + $0x370] ss:$48 sps:$4 sm:$0xff]  }
  0x76   :  { %1909 = vmatpush1.bf16.msra.mxu1 %v6105_v14  ;;  %2118 = vmatprep.subr.bf16.mxu0 %v6160_v34  ;;  %v6132_v52 = vld [vmem:[#allocation5 + $0x5a4] ss:$48 sps:$4 sm:$0xff]   ;;  %v6135_v54 = vld [vmem:[#allocation5 + $0x5a0] ss:$48 sps:$4 sm:$0xff]  }
  0x77   :  { %1910 = vmatprep.subr.bf16.mxu1 %v6106_v15  ;;  %v6190_v55 = vld [vmem:[#allocation5 + $0x3d4] ss:$48 sps:$4 sm:$0xff]   ;;  %v6195_v61 = vld [vmem:[#allocation5 + $0x3d0] ss:$48 sps:$4 sm:$0xff]  }
  0x78   :  { %v6140_v56 = vld [vmem:[#allocation5 + $0x604] ss:$48 sps:$4 sm:$0xff]   ;;  %v6138_v0 = vld [vmem:[#allocation5 + $0x600] ss:$48 sps:$4 sm:$0xff]  }
  0x79   :  { %2119 = vmatpush1.bf16.msra.mxu0 %v6165_v37  ;;  %v86_v57 = vld [vmem:[#allocation2] sm:$0xff]  ;;  %v92_v7 = vld [vmem:[#allocation2 + $0x30] sm:$0xff]  ;;  %v6188_v37 = vld [vmem:[#allocation5 + $0xc] ss:$48 sps:$4 sm:$0xff]  }
  0x7a   :  { %1911 = vmatpush1.bf16.msra.mxu1 %v6108_v22  ;;  %2120 = vmatprep.subr.bf16.mxu0 %v6166_v38  ;;  %v6196_v62 = vld [vmem:[#allocation5 + $0x434] ss:$48 sps:$4 sm:$0xff]   ;;  %v7152_v63 = vpack.c.bf16 %v89_v58, %v86_v57  ;;  %v6201_v3 = vld [vmem:[#allocation5 + $0x430] ss:$48 sps:$4 sm:$0xff]   ;;  %v7158_v11 = vpack.c.bf16 %v95_v8, %v92_v7  ;;  %v6212_v57 = vld [vmem:[#allocation5 + $0x18c] ss:$48 sps:$4 sm:$0xff]  }
  0x7b   :  { %1912 = vmatprep.subr.bf16.mxu1 %v6109_v24  ;;  %v6146_v1 = vld [vmem:[#allocation5 + $0x664] ss:$48 sps:$4 sm:$0xff]   ;;  %v6144_v5 = vld [vmem:[#allocation5 + $0x660] ss:$48 sps:$4 sm:$0xff]   ;;  %v6231_v7 = vld [vmem:[#allocation5 + $0x2ac] ss:$48 sps:$4 sm:$0xff]  }
  0x7c   :  { %v6202_v4 = vld [vmem:[#allocation5 + $0x494] ss:$48 sps:$4 sm:$0xff]   ;;  %v6207_v9 = vld [vmem:[#allocation5 + $0x490] ss:$48 sps:$4 sm:$0xff]  }
  0x7d   :  { %2121 = vmatpush1.bf16.msra.mxu0 %v6171_v41  ;;  %v6152_v6 = vld [vmem:[#allocation5 + $0x6c4] ss:$48 sps:$4 sm:$0xff]   ;;  %v6150_v12 = vld [vmem:[#allocation5 + $0x6c0] ss:$48 sps:$4 sm:$0xff]   ;;  %v6186_v41 = vld [vmem:[#allocation5 + $0x8] ss:$48 sps:$4 sm:$0xff]  }
  0x7e   :  { %1913 = vmatpush1.bf16.msra.mxu1 %v6111_v27  ;;  %2122 = vmatprep.subr.bf16.mxu0 %v6172_v42  ;;  %v6208_v10 = vld [vmem:[#allocation5 + $0x4f4] ss:$48 sps:$4 sm:$0xff]   ;;  %v6213_v14 = vld [vmem:[#allocation5 + $0x4f0] ss:$48 sps:$4 sm:$0xff]   ;;  %v6194_v42 = vld [vmem:[#allocation5 + $0x6c] ss:$48 sps:$4 sm:$0xff]  }
  0x7f   :  { %1914 = vmatprep.subr.bf16.mxu1 %v6112_v28  ;;  %v6158_v13 = vld [vmem:[#allocation5 + $0x724] ss:$48 sps:$4 sm:$0xff]   ;;  %v6156_v16 = vld [vmem:[#allocation5 + $0x720] ss:$48 sps:$4 sm:$0xff]  }
  0x80   :  { %v6214_v15 = vld [vmem:[#allocation5 + $0x554] ss:$48 sps:$4 sm:$0xff]   ;;  %v6219_v19 = vld [vmem:[#allocation5 + $0x550] ss:$48 sps:$4 sm:$0xff]  }
  0x81   :  { %2123 = vmatpush1.bf16.msra.mxu0 %v6177_v45  ;;  %v6164_v17 = vld [vmem:[#allocation5 + $0x784] ss:$48 sps:$4 sm:$0xff]   ;;  %v6162_v22 = vld [vmem:[#allocation5 + $0x780] ss:$48 sps:$4 sm:$0xff]   ;;  %v6192_v45 = vld [vmem:[#allocation5 + $0x68] ss:$48 sps:$4 sm:$0xff]  }
  0x82   :  { %1915 = vmatpush1.bf16.msra.mxu1 %v6114_v31  ;;  %2124 = vmatprep.subr.bf16.mxu0 %v6178_v46  ;;  %v6220_v21 = vld [vmem:[#allocation5 + $0x5b4] ss:$48 sps:$4 sm:$0xff]   ;;  %v6225_v24 = vld [vmem:[#allocation5 + $0x5b0] ss:$48 sps:$4 sm:$0xff]  }
  0x83   :  { %1916 = vmatprep.subr.bf16.mxu1 %v6115_v32  ;;  %v6170_v23 = vld [vmem:[#allocation5 + $0x7e4] ss:$48 sps:$4 sm:$0xff]   ;;  %v6168_v26 = vld [vmem:[#allocation5 + $0x7e0] ss:$48 sps:$4 sm:$0xff]  }
  0x84   :  { %v6228_v25 = vld [vmem:[#allocation5 + $0x614] ss:$48 sps:$4 sm:$0xff]   ;;  %v6226_v28 = vld [vmem:[#allocation5 + $0x610] ss:$48 sps:$4 sm:$0xff]  }
  0x85   :  { %2125 = vmatpush1.bf16.msra.mxu0 %v6183_v49  ;;  %v6176_v27 = vld [vmem:[#allocation5 + $0x844] ss:$48 sps:$4 sm:$0xff]   ;;  %v6174_v30 = vld [vmem:[#allocation5 + $0x840] ss:$48 sps:$4 sm:$0xff]  }
  0x86   :  { %1917 = vmatpush1.bf16.msra.mxu1 %v6117_v35  ;;  %2126 = vmatprep.subr.bf16.mxu0 %v6184_v50  ;;  %v6234_v29 = vld [vmem:[#allocation5 + $0x674] ss:$48 sps:$4 sm:$0xff]   ;;  %v6232_v32 = vld [vmem:[#allocation5 + $0x670] ss:$48 sps:$4 sm:$0xff]  }
  0x87   :  { %1918 = vmatprep.subr.bf16.mxu1 %v6118_v36  ;;  %v6182_v31 = vld [vmem:[#allocation5 + $0x8a4] ss:$48 sps:$4 sm:$0xff]   ;;  %v6180_v34 = vld [vmem:[#allocation5 + $0x8a0] ss:$48 sps:$4 sm:$0xff]   ;;  %v91_v36 = vld [vmem:[#allocation2 + $0x28] sm:$0xff] }
  0x88   :  { %v6240_v33 = vld [vmem:[#allocation5 + $0x6d4] ss:$48 sps:$4 sm:$0xff]   ;;  %v6238_v38 = vld [vmem:[#allocation5 + $0x6d0] ss:$48 sps:$4 sm:$0xff]  }
  0x89   :  { %2127 = vmatpush1.bf16.msra.mxu0 %v6189_v53  ;;  %v88_v35 = vld [vmem:[#allocation2 + $0x10] sm:$0xff]  ;;  %v94_v46 = vld [vmem:[#allocation2 + $0x40] sm:$0xff]  ;;  %v6206_v53 = vld [vmem:[#allocation5 + $0x12c] ss:$48 sps:$4 sm:$0xff]  }
  0x8a   :  { %1919 = vmatpush1.bf16.msra.mxu1 %v6120_v39  ;;  %2128 = vmatprep.subr.bf16.mxu0 %v6190_v55  ;;  %v6246_v39 = vld [vmem:[#allocation5 + $0x734] ss:$48 sps:$4 sm:$0xff]   ;;  %v6250_v49 = vld [vmem:[#allocation5 + $0x790] ss:$48 sps:$4 sm:$0xff]  }
  0x8b   :  { %1920 = vmatprep.subr.bf16.mxu1 %v6121_v40  ;;  %v7164_v40 = vpack.c.bf16 %v91_v36, %v88_v35  ;;  %v6258_v50 = vld [vmem:[#allocation5 + $0x7f4] ss:$48 sps:$4 sm:$0xff]   ;;  %v6262_v58 = vld [vmem:[#allocation5 + $0x850] ss:$48 sps:$4 sm:$0xff]  }
  0x8c   :  { %v6264_v55 = vld [vmem:[#allocation5 + $0x854] ss:$48 sps:$4 sm:$0xff]   ;;  %v6280_v8 = vld [vmem:[#allocation5 + $0x80] ss:$48 sps:$4 sm:$0xff]  }
  0x8d   :  { %2129 = vmatpush1.bf16.msra.mxu0 %v6195_v61  ;;  %v6270_v59 = vld [vmem:[#allocation5 + $0x8b4] ss:$48 sps:$4 sm:$0xff]   ;;  %v6218_v61 = vld [vmem:[#allocation5 + $0x1ec] ss:$48 sps:$4 sm:$0xff]   ;;  %v6316_v35 = vld [vmem:[#allocation5 + $0x2c0] ss:$48 sps:$4 sm:$0xff]  }
  0x8e   :  { %1921 = vmatpush1.bf16.msra.mxu1 %v6123_v43  ;;  %2130 = vmatprep.subr.bf16.mxu0 %v6196_v62  ;;  %v6244_v43 = vld [vmem:[#allocation5 + $0x730] ss:$48 sps:$4 sm:$0xff]   ;;  %v6324_v36 = vld [vmem:[#allocation5 + $0x324] ss:$48 sps:$4 sm:$0xff]  }
  0x8f   :  { %1922 = vmatprep.subr.bf16.mxu1 %v6124_v44  ;;  %v6252_v44 = vld [vmem:[#allocation5 + $0x794] ss:$48 sps:$4 sm:$0xff]   ;;  %v6268_v62 = vld [vmem:[#allocation5 + $0x8b0] ss:$48 sps:$4 sm:$0xff]  }
  0x91   :  { %2131 = vmatpush1.bf16.msra.mxu0 %v6201_v3  ;;  %v6224_v3 = vld [vmem:[#allocation5 + $0x24c] ss:$48 sps:$4 sm:$0xff]  }
  0x92   :  { %1923 = vmatpush1.bf16.msra.mxu1 %v6126_v47  ;;  %2132 = vmatprep.subr.bf16.mxu0 %v6202_v4  ;;  %v97_v47 = vld [vmem:[#allocation2 + $0x58] sm:$0xff]  ;;  %v6274_v4 = vld [vmem:[#allocation5 + $0x20] ss:$48 sps:$4 sm:$0xff]  }
  0x93   :  { %1924 = vmatprep.subr.bf16.mxu1 %v6127_v48  ;;  %v6200_v48 = vld [vmem:[#allocation5 + $0xcc] ss:$48 sps:$4 sm:$0xff]  }
  0x95   :  { %2133 = vmatpush1.bf16.msra.mxu0 %v6207_v9  ;;  %v6288_v9 = vld [vmem:[#allocation5 + $0xe4] ss:$48 sps:$4 sm:$0xff]  }
  0x96   :  { %1925 = vmatpush1.bf16.msra.mxu1 %v6129_v51  ;;  %2134 = vmatprep.subr.bf16.mxu0 %v6208_v10  ;;  %v7170_v51 = vpack.c.bf16 %v97_v47, %v94_v46  ;;  %v6229_v10 = vld [vmem:[#allocation5 + $0x2a8] ss:$48 sps:$4 sm:$0xff]   ;;  %v6285_v47 = vld [vmem:[#allocation5 + $0x60c] ss:$48 sps:$4 sm:$0xff]  }
  0x97   :  { %1926 = vmatprep.subr.bf16.mxu1 %v6132_v52  ;;  %v6198_v52 = vld [vmem:[#allocation5 + $0xc8] ss:$48 sps:$4 sm:$0xff]  }
  0x98   :  { %v6277_v46 = vld [vmem:[#allocation5 + $0x5a8] ss:$48 sps:$4 sm:$0xff]  }
  0x99   :  { %2135 = vmatpush1.bf16.msra.mxu0 %v6213_v14  ;;  %v6294_v14 = vld [vmem:[#allocation5 + $0x144] ss:$48 sps:$4 sm:$0xff]  }
  0x9a   :  { %1927 = vmatpush1.bf16.msra.mxu1 %v6135_v54  ;;  %2136 = vmatprep.subr.bf16.mxu0 %v6214_v15  ;;  %v6256_v54 = vld [vmem:[#allocation5 + $0x7f0] ss:$48 sps:$4 sm:$0xff]   ;;  %v6235_v15 = vld [vmem:[#allocation5 + $0x308] ss:$48 sps:$4 sm:$0xff]  }
  0x9b   :  { %1949 = vmatprep.subr.bf16.mxu1 %v6140_v56  ;;  %v6204_v56 = vld [vmem:[#allocation5 + $0x128] ss:$48 sps:$4 sm:$0xff]  }
  0x9d   :  { %1929 = vmatmul.mubr.bf16.vlgmr.msra.gmra.mrb[0].mxu1 %v7152_v63  ;;  %2137 = vmatpush1.bf16.msra.mxu0 %v6219_v19  ;;  %v6300_v19 = vld [vmem:[#allocation5 + $0x1a4] ss:$48 sps:$4 sm:$0xff]  }
  0x9e   :  { %1950 = vmatpush1.bf16.msra.mxu1 %v6138_v0  ;;  %1938 = vmatprep.mubr.bf16.mxu1 %v7154_v2  ;;  %v6276_v0 = vld [vmem:[#allocation5 + $0x24] ss:$48 sps:$4 sm:$0xff]  }
  0x9f   :  { %1951 = vmatprep.subr.bf16.mxu1 %v6146_v1  ;;  %2138 = vmatprep.subr.bf16.mxu0 %v6220_v21  ;;  %v6216_v1 = vld [vmem:[#allocation5 + $0x1e8] ss:$48 sps:$4 sm:$0xff]  }
  0xa0   :  { %v6241_v21 = vld [vmem:[#allocation5 + $0x368] ss:$48 sps:$4 sm:$0xff]  }
  0xa1   :  { %2139 = vmatpush1.bf16.msra.mxu0 %v6225_v24  ;;  %v6306_v24 = vld [vmem:[#allocation5 + $0x204] ss:$48 sps:$4 sm:$0xff]  }
  0xa2   :  { %1952 = vmatpush1.bf16.msra.mxu1 %v6144_v5  ;;  %2161 = vmatprep.subr.bf16.mxu0 %v6228_v25  ;;  %v6282_v5 = vld [vmem:[#allocation5 + $0x84] ss:$48 sps:$4 sm:$0xff]   ;;  %v6247_v25 = vld [vmem:[#allocation5 + $0x3c8] ss:$48 sps:$4 sm:$0xff]  }
  0xa3   :  { %1953 = vmatprep.subr.bf16.mxu1 %v6152_v6  ;;  %v6222_v6 = vld [vmem:[#allocation5 + $0x248] ss:$48 sps:$4 sm:$0xff]  }
  0xa4   :  { %2141 = vmatmul.mubr.bf16.vlgmr.msra.gmra.mrb[0].mxu0 %v7152_v63 }
  0xa5   :  { %1939 = vmatmul.mubr.bf16.gmra.mrb[4].mxu1 %v7158_v11  ;;  %2162 = vmatpush1.bf16.msra.mxu0 %v6226_v28  ;;  %v6312_v28 = vld [vmem:[#allocation5 + $0x264] ss:$48 sps:$4 sm:$0xff]  }
  0xa6   :  { %1954 = vmatpush1.bf16.msra.mxu1 %v6150_v12  ;;  %1981 = vmatprep.mubr.bf16.mxu1 %v7053_v18  ;;  %v6237_v12 = vld [vmem:[#allocation5 + $0x30c] ss:$48 sps:$4 sm:$0xff]  }
  0xa7   :  { %1955 = vmatprep.subr.bf16.mxu1 %v6158_v13  ;;  %2163 = vmatprep.subr.bf16.mxu0 %v6234_v29  ;;  %v6286_v13 = vld [vmem:[#allocation5 + $0xe0] ss:$48 sps:$4 sm:$0xff]   ;;  %v6253_v29 = vld [vmem:[#allocation5 + $0x428] ss:$48 sps:$4 sm:$0xff]  }
  0xa8   :  { %2150 = vmatprep.mubr.bf16.mxu0 %v7154_v2 }
  0xa9   :  { %2164 = vmatpush1.bf16.msra.mxu0 %v6232_v32  ;;  %v6318_v32 = vld [vmem:[#allocation5 + $0x2c4] ss:$48 sps:$4 sm:$0xff]  }
  0xaa   :  { %1956 = vmatpush1.bf16.msra.mxu1 %v6156_v16  ;;  %2165 = vmatprep.subr.bf16.mxu0 %v6240_v33  ;;  %v6243_v16 = vld [vmem:[#allocation5 + $0x36c] ss:$48 sps:$4 sm:$0xff]   ;;  %v6259_v33 = vld [vmem:[#allocation5 + $0x488] ss:$48 sps:$4 sm:$0xff]  }
  0xab   :  { %1957 = vmatprep.subr.bf16.mxu1 %v6164_v17  ;;  %v6292_v17 = vld [vmem:[#allocation5 + $0x140] ss:$48 sps:$4 sm:$0xff]  }
  0xac   :  { %2151 = vmatmul.mubr.bf16.gmra.mrb[4].mxu0 %v7158_v11 }
  0xad   :  { %2166 = vmatpush1.bf16.msra.mxu0 %v6238_v38  ;;  %2193 = vmatprep.mubr.bf16.mxu0 %v7053_v18  ;;  %v6273_v38 = vld [vmem:[#allocation5 + $0x54c] ss:$48 sps:$4 sm:$0xff]  }
  0xae   :  { %1958 = vmatpush1.bf16.msra.mxu1 %v6162_v22  ;;  %2167 = vmatprep.subr.bf16.mxu0 %v6246_v39  ;;  %v6249_v22 = vld [vmem:[#allocation5 + $0x3cc] ss:$48 sps:$4 sm:$0xff]   ;;  %v6322_v39 = vld [vmem:[#allocation5 + $0x320] ss:$48 sps:$4 sm:$0xff]  }
  0xaf   :  { %1959 = vmatprep.subr.bf16.mxu1 %v6170_v23  ;;  %v6298_v23 = vld [vmem:[#allocation5 + $0x1a0] ss:$48 sps:$4 sm:$0xff]  }
  0xb1   :  { %2168 = vmatpush1.bf16.msra.mxu0 %v6244_v43  ;;  %v6279_v43 = vld [vmem:[#allocation5 + $0x5ac] ss:$48 sps:$4 sm:$0xff]  }
  0xb2   :  { %1960 = vmatpush1.bf16.msra.mxu1 %v6168_v26  ;;  %2169 = vmatprep.subr.bf16.mxu0 %v6252_v44  ;;  %v6255_v26 = vld [vmem:[#allocation5 + $0x42c] ss:$48 sps:$4 sm:$0xff]   ;;  %v6328_v44 = vld [vmem:[#allocation5 + $0x380] ss:$48 sps:$4 sm:$0xff]  }
  0xb3   :  { %1961 = vmatprep.subr.bf16.mxu1 %v6176_v27  ;;  %v6304_v27 = vld [vmem:[#allocation5 + $0x200] ss:$48 sps:$4 sm:$0xff]  }
  0xb5   :  { %2170 = vmatpush1.bf16.msra.mxu0 %v6250_v49  ;;  %v6342_v49 = vld [vmem:[#allocation5 + $0x444] ss:$48 sps:$4 sm:$0xff]  }
  0xb6   :  { %1962 = vmatpush1.bf16.msra.mxu1 %v6174_v30  ;;  %2171 = vmatprep.subr.bf16.mxu0 %v6258_v50  ;;  %v6261_v30 = vld [vmem:[#allocation5 + $0x48c] ss:$48 sps:$4 sm:$0xff]   ;;  %v6283_v50 = vld [vmem:[#allocation5 + $0x608] ss:$48 sps:$4 sm:$0xff]  }
  0xb7   :  { %1963 = vmatprep.subr.bf16.mxu1 %v6182_v31  ;;  %v6310_v31 = vld [vmem:[#allocation5 + $0x260] ss:$48 sps:$4 sm:$0xff]  }
  0xb9   :  { %2172 = vmatpush1.bf16.msra.mxu0 %v6256_v54  ;;  %v6348_v54 = vld [vmem:[#allocation5 + $0x4a4] ss:$48 sps:$4 sm:$0xff]  }
  0xba   :  { %1964 = vmatpush1.bf16.msra.mxu1 %v6180_v34  ;;  %2173 = vmatprep.subr.bf16.mxu0 %v6264_v55  ;;  %v6267_v34 = vld [vmem:[#allocation5 + $0x4ec] ss:$48 sps:$4 sm:$0xff]   ;;  %v6289_v55 = vld [vmem:[#allocation5 + $0x668] ss:$48 sps:$4 sm:$0xff]  }
  0xbb   :  { %2002 = vmatprep.subr.bf16.mxu1 %v6188_v37  ;;  %v6265_v37 = vld [vmem:[#allocation5 + $0x4e8] ss:$48 sps:$4 sm:$0xff]  }
  0xbd   :  { %1982 = vmatmul.mubr.bf16.vlgmr.msra.gmra.mrb[0].mxu1 %v7164_v40  ;;  %2174 = vmatpush1.bf16.msra.mxu0 %v6262_v58  ;;  %v6354_v58 = vld [vmem:[#allocation5 + $0x504] ss:$48 sps:$4 sm:$0xff]  }
  0xbe   :  { %2003 = vmatpush1.bf16.msra.mxu1 %v6186_v41  ;;  %1991 = vmatprep.mubr.bf16.mxu1 %v7053_v18  ;;  %v6330_v41 = vld [vmem:[#allocation5 + $0x384] ss:$48 sps:$4 sm:$0xff]  }
  0xbf   :  { %2004 = vmatprep.subr.bf16.mxu1 %v6194_v42  ;;  %2175 = vmatprep.subr.bf16.mxu0 %v6270_v59  ;;  %v6271_v42 = vld [vmem:[#allocation5 + $0x548] ss:$48 sps:$4 sm:$0xff]  }
  0xc0   :  { %v6295_v59 = vld [vmem:[#allocation5 + $0x6c8] ss:$48 sps:$4 sm:$0xff]  }
  0xc1   :  { %2176 = vmatpush1.bf16.msra.mxu0 %v6268_v62  ;;  %v6360_v62 = vld [vmem:[#allocation5 + $0x564] ss:$48 sps:$4 sm:$0xff]  }
  0xc2   :  { %2005 = vmatpush1.bf16.msra.mxu1 %v6192_v45  ;;  %2320 = vmatprep.subr.bf16.mxu0 %v6276_v0  ;;  %v6336_v45 = vld [vmem:[#allocation5 + $0x3e4] ss:$48 sps:$4 sm:$0xff]   ;;  %v6301_v0 = vld [vmem:[#allocation5 + $0x728] ss:$48 sps:$4 sm:$0xff]  }
  0xc3   :  { %2006 = vmatprep.subr.bf16.mxu1 %v6200_v48  ;;  %v6334_v48 = vld [vmem:[#allocation5 + $0x3e0] ss:$48 sps:$4 sm:$0xff]  }
  0xc4   :  { %2194 = vmatmul.mubr.bf16.vlgmr.msra.gmra.mrb[0].mxu0 %v7164_v40 }
  0xc5   :  { %1992 = vmatmul.mubr.bf16.gmra.mrb[4].mxu1 %v7170_v51  ;;  %2321 = vmatpush1.bf16.msra.mxu0 %v6274_v4  ;;  %v6366_v4 = vld [vmem:[#allocation5 + $0x5c4] ss:$48 sps:$4 sm:$0xff]  }
  0xc6   :  { %2007 = vmatpush1.bf16.msra.mxu1 %v6198_v52  ;;  %2034 = vmatprep.mubr.bf16.mxu1 %v7148_v20  ;;  %v6291_v52 = vld [vmem:[#allocation5 + $0x66c] ss:$48 sps:$4 sm:$0xff]  }
  0xc7   :  { %2008 = vmatprep.subr.bf16.mxu1 %v6206_v53  ;;  %2322 = vmatprep.subr.bf16.mxu0 %v6282_v5  ;;  %v6340_v53 = vld [vmem:[#allocation5 + $0x440] ss:$48 sps:$4 sm:$0xff]   ;;  %v6307_v5 = vld [vmem:[#allocation5 + $0x788] ss:$48 sps:$4 sm:$0xff]  }
  0xc8   :  { %2203 = vmatprep.mubr.bf16.mxu0 %v7053_v18 }
  0xc9   :  { %2323 = vmatpush1.bf16.msra.mxu0 %v6280_v8  ;;  %v6372_v8 = vld [vmem:[#allocation5 + $0x624] ss:$48 sps:$4 sm:$0xff]  }
  0xca   :  { %2009 = vmatpush1.bf16.msra.mxu1 %v6204_v56  ;;  %2324 = vmatprep.subr.bf16.mxu0 %v6288_v9  ;;  %v6297_v56 = vld [vmem:[#allocation5 + $0x6cc] ss:$48 sps:$4 sm:$0xff]   ;;  %v6313_v9 = vld [vmem:[#allocation5 + $0x7e8] ss:$48 sps:$4 sm:$0xff]  }
  0xcb   :  { %2010 = vmatprep.subr.bf16.mxu1 %v6212_v57  ;;  %v6346_v57 = vld [vmem:[#allocation5 + $0x4a0] ss:$48 sps:$4 sm:$0xff]  }
  0xcc   :  { %2204 = vmatmul.mubr.bf16.gmra.mrb[4].mxu0 %v7170_v51 }
  0xcd   :  { %2325 = vmatpush1.bf16.msra.mxu0 %v6286_v13  ;;  %2352 = vmatprep.mubr.bf16.mxu0 %v7148_v20  ;;  %v6378_v13 = vld [vmem:[#allocation5 + $0x684] ss:$48 sps:$4 sm:$0xff]  }
  0xce   :  { %2011 = vmatpush1.bf16.msra.mxu1 %v6210_v60  ;;  %2326 = vmatprep.subr.bf16.mxu0 %v6294_v14  ;;  %v6303_v60 = vld [vmem:[#allocation5 + $0x72c] ss:$48 sps:$4 sm:$0xff]   ;;  %v6319_v14 = vld [vmem:[#allocation5 + $0x848] ss:$48 sps:$4 sm:$0xff]  }
  0xcf   :  { %2012 = vmatprep.subr.bf16.mxu1 %v6218_v61  ;;  %v6352_v61 = vld [vmem:[#allocation5 + $0x500] ss:$48 sps:$4 sm:$0xff]  }
  0xd1   :  { %2327 = vmatpush1.bf16.msra.mxu0 %v6292_v17  ;;  %v6384_v17 = vld [vmem:[#allocation5 + $0x6e4] ss:$48 sps:$4 sm:$0xff]  }
  0xd2   :  { %2013 = vmatpush1.bf16.msra.mxu1 %v6216_v1  ;;  %2328 = vmatprep.subr.bf16.mxu0 %v6300_v19  ;;  %v6309_v1 = vld [vmem:[#allocation5 + $0x78c] ss:$48 sps:$4 sm:$0xff]   ;;  %v6325_v19 = vld [vmem:[#allocation5 + $0x8a8] ss:$48 sps:$4 sm:$0xff]  }
  0xd3   :  { %2014 = vmatprep.subr.bf16.mxu1 %v6224_v3  ;;  %v6358_v3 = vld [vmem:[#allocation5 + $0x560] ss:$48 sps:$4 sm:$0xff]  }
  0xd5   :  { %2329 = vmatpush1.bf16.msra.mxu0 %v6298_v23  ;;  %v6390_v23 = vld [vmem:[#allocation5 + $0x744] ss:$48 sps:$4 sm:$0xff]  }
  0xd6   :  { %2015 = vmatpush1.bf16.msra.mxu1 %v6222_v6  ;;  %2330 = vmatprep.subr.bf16.mxu0 %v6306_v24  ;;  %v6315_v6 = vld [vmem:[#allocation5 + $0x7ec] ss:$48 sps:$4 sm:$0xff]   ;;  %v6331_v24 = vld [vmem:[#allocation5 + $0x18] ss:$48 sps:$4 sm:$0xff]  }
  0xd7   :  { %2016 = vmatprep.subr.bf16.mxu1 %v6231_v7  ;;  %v6364_v7 = vld [vmem:[#allocation5 + $0x5c0] ss:$48 sps:$4 sm:$0xff]  }
  0xd9   :  { %2331 = vmatpush1.bf16.msra.mxu0 %v6304_v27  ;;  %v6396_v27 = vld [vmem:[#allocation5 + $0x7a4] ss:$48 sps:$4 sm:$0xff]  }
  0xda   :  { %2017 = vmatpush1.bf16.msra.mxu1 %v6229_v10  ;;  %2332 = vmatprep.subr.bf16.mxu0 %v6312_v28  ;;  %v6321_v10 = vld [vmem:[#allocation5 + $0x84c] ss:$48 sps:$4 sm:$0xff]   ;;  %v6337_v28 = vld [vmem:[#allocation5 + $0x78] ss:$48 sps:$4 sm:$0xff]  }
  0xdb   :  { %2018 = vmatprep.subr.bf16.mxu1 %v6237_v12  ;;  %v6370_v12 = vld [vmem:[#allocation5 + $0x620] ss:$48 sps:$4 sm:$0xff]  }
  0xdd   :  { %2333 = vmatpush1.bf16.msra.mxu0 %v6310_v31  ;;  %v6402_v31 = vld [vmem:[#allocation5 + $0x804] ss:$48 sps:$4 sm:$0xff]  }
  0xde   :  { %2019 = vmatpush1.bf16.msra.mxu1 %v6235_v15  ;;  %2334 = vmatprep.subr.bf16.mxu0 %v6318_v32  ;;  %v6327_v15 = vld [vmem:[#allocation5 + $0x8ac] ss:$48 sps:$4 sm:$0xff]   ;;  %v6343_v32 = vld [vmem:[#allocation5 + $0xd8] ss:$48 sps:$4 sm:$0xff]  }
  0xdf   :  { %2020 = vmatprep.subr.bf16.mxu1 %v6243_v16  ;;  %v6376_v16 = vld [vmem:[#allocation5 + $0x680] ss:$48 sps:$4 sm:$0xff]  }
  0xe1   :  { %2335 = vmatpush1.bf16.msra.mxu0 %v6316_v35  ;;  %v6408_v35 = vld [vmem:[#allocation5 + $0x864] ss:$48 sps:$4 sm:$0xff]  }
  0xe2   :  { %2021 = vmatpush1.bf16.msra.mxu1 %v6241_v21  ;;  %2336 = vmatprep.subr.bf16.mxu0 %v6324_v36  ;;  %v6333_v21 = vld [vmem:[#allocation5 + $0x1c] ss:$48 sps:$4 sm:$0xff]   ;;  %v6349_v36 = vld [vmem:[#allocation5 + $0x138] ss:$48 sps:$4 sm:$0xff]  }
  0xe3   :  { %2022 = vmatprep.subr.bf16.mxu1 %v6249_v22  ;;  %v6382_v22 = vld [vmem:[#allocation5 + $0x6e0] ss:$48 sps:$4 sm:$0xff]  }
  0xe5   :  { %2337 = vmatpush1.bf16.msra.mxu0 %v6322_v39  ;;  %v6414_v39 = vld [vmem:[#allocation5 + $0x8c4] ss:$48 sps:$4 sm:$0xff]  }
  0xe6   :  { %2023 = vmatpush1.bf16.msra.mxu1 %v6247_v25  ;;  %2338 = vmatprep.subr.bf16.mxu0 %v6330_v41  ;;  %v6339_v25 = vld [vmem:[#allocation5 + $0x7c] ss:$48 sps:$4 sm:$0xff]   ;;  %v6355_v41 = vld [vmem:[#allocation5 + $0x198] ss:$48 sps:$4 sm:$0xff]  }
  0xe7   :  { %2024 = vmatprep.subr.bf16.mxu1 %v6255_v26  ;;  %v6388_v26 = vld [vmem:[#allocation5 + $0x740] ss:$48 sps:$4 sm:$0xff]  }
  0xe9   :  { %2339 = vmatpush1.bf16.msra.mxu0 %v6328_v44  ;;  %v6423_v44 = vld [vmem:[#allocation8 + $0x4] ss:$12 sps:$4 sm:$0xff]  }
  0xea   :  { %2025 = vmatpush1.bf16.msra.mxu1 %v6253_v29  ;;  %2340 = vmatprep.subr.bf16.mxu0 %v6336_v45  ;;  %v6345_v29 = vld [vmem:[#allocation5 + $0xdc] ss:$48 sps:$4 sm:$0xff]   ;;  %v6361_v45 = vld [vmem:[#allocation5 + $0x1f8] ss:$48 sps:$4 sm:$0xff]  }
  0xeb   :  { %2026 = vmatprep.subr.bf16.mxu1 %v6261_v30  ;;  %v6394_v30 = vld [vmem:[#allocation5 + $0x7a0] ss:$48 sps:$4 sm:$0xff]  }
  0xed   :  { %2341 = vmatpush1.bf16.msra.mxu0 %v6334_v48  ;;  %v6429_v48 = vld [vmem:[#allocation8 + $0x1c] ss:$12 sps:$4 sm:$0xff]  }
  0xee   :  { %2027 = vmatpush1.bf16.msra.mxu1 %v6259_v33  ;;  %2342 = vmatprep.subr.bf16.mxu0 %v6342_v49  ;;  %v6351_v33 = vld [vmem:[#allocation5 + $0x13c] ss:$48 sps:$4 sm:$0xff]   ;;  %v6367_v49 = vld [vmem:[#allocation5 + $0x258] ss:$48 sps:$4 sm:$0xff]  }
  0xef   :  { %2028 = vmatprep.subr.bf16.mxu1 %v6267_v34  ;;  %v6400_v34 = vld [vmem:[#allocation5 + $0x800] ss:$48 sps:$4 sm:$0xff]  }
  0xf1   :  { %2343 = vmatpush1.bf16.msra.mxu0 %v6340_v53  ;;  %v6435_v53 = vld [vmem:[#allocation8 + $0x34] ss:$12 sps:$4 sm:$0xff]  }
  0xf2   :  { %2029 = vmatpush1.bf16.msra.mxu1 %v6265_v37  ;;  %2344 = vmatprep.subr.bf16.mxu0 %v6348_v54  ;;  %v6357_v37 = vld [vmem:[#allocation5 + $0x19c] ss:$48 sps:$4 sm:$0xff]   ;;  %v6373_v54 = vld [vmem:[#allocation5 + $0x2b8] ss:$48 sps:$4 sm:$0xff]  }
  0xf3   :  { %2030 = vmatprep.subr.bf16.mxu1 %v6273_v38  ;;  %v6406_v38 = vld [vmem:[#allocation5 + $0x860] ss:$48 sps:$4 sm:$0xff]  }
  0xf5   :  { %2345 = vmatpush1.bf16.msra.mxu0 %v6346_v57  ;;  %v6441_v57 = vld [vmem:[#allocation8 + $0x4c] ss:$12 sps:$4 sm:$0xff]  }
  0xf6   :  { %2031 = vmatpush1.bf16.msra.mxu1 %v6271_v42  ;;  %2346 = vmatprep.subr.bf16.mxu0 %v6354_v58  ;;  %v6363_v42 = vld [vmem:[#allocation5 + $0x1fc] ss:$48 sps:$4 sm:$0xff]   ;;  %v6379_v58 = vld [vmem:[#allocation5 + $0x318] ss:$48 sps:$4 sm:$0xff]  }
  0xf7   :  { %2032 = vmatprep.subr.bf16.mxu1 %v6279_v43  ;;  %v6412_v43 = vld [vmem:[#allocation5 + $0x8c0] ss:$48 sps:$4 sm:$0xff]  }
  0xf9   :  { %2347 = vmatpush1.bf16.msra.mxu0 %v6352_v61  ;;  %v6447_v61 = vld [vmem:[#allocation8 + $0x64] ss:$12 sps:$4 sm:$0xff]  }
  0xfa   :  { %2033 = vmatpush1.bf16.msra.mxu1 %v6277_v46  ;;  %2348 = vmatprep.subr.bf16.mxu0 %v6360_v62  ;;  %v6369_v46 = vld [vmem:[#allocation5 + $0x25c] ss:$48 sps:$4 sm:$0xff]   ;;  %v6385_v62 = vld [vmem:[#allocation5 + $0x378] ss:$48 sps:$4 sm:$0xff]  }
  0xfb   :  { %2055 = vmatprep.subr.bf16.mxu1 %v6285_v47  ;;  %v6421_v47 = vld [vmem:[#allocation8] ss:$12 sps:$4 sm:$0xff]  }
  0xfd   :  { %2035 = vmatmul.mubr.bf16.vlgmr.msra.gmra.mrb[8].mxu1 %v7152_v63  ;;  %2349 = vmatpush1.bf16.msra.mxu0 %v6358_v3  ;;  %v6453_v3 = vld [vmem:[#allocation8 + $0x7c] ss:$12 sps:$4 sm:$0xff]  }
  0xfe   :  { %2056 = vmatpush1.bf16.msra.mxu1 %v6283_v50  ;;  %2044 = vmatprep.mubr.bf16.mxu1 %v7154_v2  ;;  %v6375_v50 = vld [vmem:[#allocation5 + $0x2bc] ss:$48 sps:$4 sm:$0xff]  }
  0xff   :  { %2057 = vmatprep.subr.bf16.mxu1 %v6291_v52  ;;  %2350 = vmatprep.subr.bf16.mxu0 %v6366_v4  ;;  %v6427_v52 = vld [vmem:[#allocation8 + $0x18] ss:$12 sps:$4 sm:$0xff]   ;;  %v6391_v4 = vld [vmem:[#allocation5 + $0x3d8] ss:$48 sps:$4 sm:$0xff]  }
 0x101   :  { %2351 = vmatpush1.bf16.msra.mxu0 %v6364_v7  ;;  %v6459_v7 = vld [vmem:[#allocation8 + $0x94] ss:$12 sps:$4 sm:$0xff]  }
 0x102   :  { %2058 = vmatpush1.bf16.msra.mxu1 %v6289_v55  ;;  %2373 = vmatprep.subr.bf16.mxu0 %v6372_v8  ;;  %v6381_v55 = vld [vmem:[#allocation5 + $0x31c] ss:$48 sps:$4 sm:$0xff]   ;;  %v6397_v8 = vld [vmem:[#allocation5 + $0x438] ss:$48 sps:$4 sm:$0xff]  }
 0x103   :  { %2059 = vmatprep.subr.bf16.mxu1 %v6297_v56  ;;  %v6433_v56 = vld [vmem:[#allocation8 + $0x30] ss:$12 sps:$4 sm:$0xff]  }
 0x104   :  { %2353 = vmatmul.mubr.bf16.vlgmr.msra.gmra.mrb[8].mxu0 %v7152_v63 }
 0x105   :  { %2045 = vmatmul.mubr.bf16.gmra.mrb[12].mxu1 %v7158_v11  ;;  %2374 = vmatpush1.bf16.msra.mxu0 %v6370_v12  ;;  %v6465_v12 = vld [vmem:[#allocation8 + $0xac] ss:$12 sps:$4 sm:$0xff]  }
 0x106   :  { %2060 = vmatpush1.bf16.msra.mxu1 %v6295_v59  ;;  %2087 = vmatprep.mubr.bf16.mxu1 %v7053_v18  ;;  %v6387_v59 = vld [vmem:[#allocation5 + $0x37c] ss:$48 sps:$4 sm:$0xff]  }
 0x107   :  { %2061 = vmatprep.subr.bf16.mxu1 %v6303_v60  ;;  %2375 = vmatprep.subr.bf16.mxu0 %v6378_v13  ;;  %v6439_v60 = vld [vmem:[#allocation8 + $0x48] ss:$12 sps:$4 sm:$0xff]   ;;  %v6403_v13 = vld [vmem:[#allocation5 + $0x498] ss:$48 sps:$4 sm:$0xff]  }
 0x108   :  { %2362 = vmatprep.mubr.bf16.mxu0 %v7154_v2 }
 0x109   :  { %2376 = vmatpush1.bf16.msra.mxu0 %v6376_v16  ;;  %v6471_v16 = vld [vmem:[#allocation8 + $0xc4] ss:$12 sps:$4 sm:$0xff]  }
 0x10a   :  { %2062 = vmatpush1.bf16.msra.mxu1 %v6301_v0  ;;  %2377 = vmatprep.subr.bf16.mxu0 %v6384_v17  ;;  %v6393_v0 = vld [vmem:[#allocation5 + $0x3dc] ss:$48 sps:$4 sm:$0xff]   ;;  %v6409_v17 = vld [vmem:[#allocation5 + $0x4f8] ss:$48 sps:$4 sm:$0xff]  }
 0x10b   :  { %2063 = vmatprep.subr.bf16.mxu1 %v6309_v1  ;;  %v6445_v1 = vld [vmem:[#allocation8 + $0x60] ss:$12 sps:$4 sm:$0xff]  }
 0x10c   :  { %2363 = vmatmul.mubr.bf16.gmra.mrb[12].mxu0 %v7158_v11 }
 0x10d   :  { %2378 = vmatpush1.bf16.msra.mxu0 %v6382_v22  ;;  %2405 = vmatprep.mubr.bf16.mxu0 %v7053_v18  ;;  %v6477_v22 = vld [vmem:[#allocation8 + $0xdc] ss:$12 sps:$4 sm:$0xff]  }
 0x10e   :  { %2064 = vmatpush1.bf16.msra.mxu1 %v6307_v5  ;;  %2379 = vmatprep.subr.bf16.mxu0 %v6390_v23  ;;  %v6399_v5 = vld [vmem:[#allocation5 + $0x43c] ss:$48 sps:$4 sm:$0xff]   ;;  %v6415_v23 = vld [vmem:[#allocation5 + $0x558] ss:$48 sps:$4 sm:$0xff]  }
 0x10f   :  { %2065 = vmatprep.subr.bf16.mxu1 %v6315_v6  ;;  %v6451_v6 = vld [vmem:[#allocation8 + $0x78] ss:$12 sps:$4 sm:$0xff]  }
 0x111   :  { %2380 = vmatpush1.bf16.msra.mxu0 %v6388_v26  ;;  %v6483_v26 = vld [vmem:[#allocation8 + $0xf4] ss:$12 sps:$4 sm:$0xff]  }
 0x112   :  { %2066 = vmatpush1.bf16.msra.mxu1 %v6313_v9  ;;  %2381 = vmatprep.subr.bf16.mxu0 %v6396_v27  ;;  %v6405_v9 = vld [vmem:[#allocation5 + $0x49c] ss:$48 sps:$4 sm:$0xff]   ;;  %v6418_v27 = vld [vmem:[#allocation5 + $0x5b8] ss:$48 sps:$4 sm:$0xff]  }
 0x113   :  { %2067 = vmatprep.subr.bf16.mxu1 %v6321_v10  ;;  %v6457_v10 = vld [vmem:[#allocation8 + $0x90] ss:$12 sps:$4 sm:$0xff]  }
 0x115   :  { %2382 = vmatpush1.bf16.msra.mxu0 %v6394_v30  ;;  %v6424_v30 = vld [vmem:[#allocation5 + $0x618] ss:$48 sps:$4 sm:$0xff]  }
 0x116   :  { %2068 = vmatpush1.bf16.msra.mxu1 %v6319_v14  ;;  %2383 = vmatprep.subr.bf16.mxu0 %v6402_v31  ;;  %v6411_v14 = vld [vmem:[#allocation5 + $0x4fc] ss:$48 sps:$4 sm:$0xff]   ;;  %v6489_v31 = vld [vmem:[#allocation8 + $0x10c] ss:$12 sps:$4 sm:$0xff]  }
 0x117   :  { %2069 = vmatprep.subr.bf16.mxu1 %v6327_v15  ;;  %v6463_v15 = vld [vmem:[#allocation8 + $0xa8] ss:$12 sps:$4 sm:$0xff]  }
 0x119   :  { %2384 = vmatpush1.bf16.msra.mxu0 %v6400_v34  ;;  %v6495_v34 = vld [vmem:[#allocation8 + $0x124] ss:$12 sps:$4 sm:$0xff]  }
 0x11a   :  { %2070 = vmatpush1.bf16.msra.mxu1 %v6325_v19  ;;  %2385 = vmatprep.subr.bf16.mxu0 %v6408_v35  ;;  %v6417_v19 = vld [vmem:[#allocation5 + $0x55c] ss:$48 sps:$4 sm:$0xff]   ;;  %v6430_v35 = vld [vmem:[#allocation5 + $0x678] ss:$48 sps:$4 sm:$0xff]  }
 0x11b   :  { %2214 = vmatprep.subr.bf16.mxu1 %v6333_v21  ;;  %v6469_v21 = vld [vmem:[#allocation8 + $0xc0] ss:$12 sps:$4 sm:$0xff]  }
 0x11d   :  { %2088 = vmatmul.mubr.bf16.vlgmr.msra.gmra.mrb[8].mxu1 %v7164_v40  ;;  %2386 = vmatpush1.bf16.msra.mxu0 %v6406_v38  ;;  %v6501_v38 = vld [vmem:[#allocation8 + $0x13c] ss:$12 sps:$4 sm:$0xff]  }
 0x11e   :  { %2215 = vmatpush1.bf16.msra.mxu1 %v6331_v24  ;;  %2097 = vmatprep.mubr.bf16.mxu1 %v7053_v18  ;;  %v6420_v24 = vld [vmem:[#allocation5 + $0x5bc] ss:$48 sps:$4 sm:$0xff]  }
 0x11f   :  { %2216 = vmatprep.subr.bf16.mxu1 %v6339_v25  ;;  %2387 = vmatprep.subr.bf16.mxu0 %v6414_v39  ;;  %v6475_v25 = vld [vmem:[#allocation8 + $0xd8] ss:$12 sps:$4 sm:$0xff]   ;;  %v6436_v39 = vld [vmem:[#allocation5 + $0x6d8] ss:$48 sps:$4 sm:$0xff]  }
 0x121   :  { %2388 = vmatpush1.bf16.msra.mxu0 %v6412_v43  ;;  %v6507_v43 = vld [vmem:[#allocation8 + $0x154] ss:$12 sps:$4 sm:$0xff]  }
 0x122   :  { %2217 = vmatpush1.bf16.msra.mxu1 %v6337_v28  ;;  %4541 = vmatprep.subr.bf16.mxu0 %v6423_v44  ;;  %v6426_v28 = vld [vmem:[#allocation5 + $0x61c] ss:$48 sps:$4 sm:$0xff]   ;;  %v6442_v44 = vld [vmem:[#allocation5 + $0x738] ss:$48 sps:$4 sm:$0xff]  }
 0x123   :  { %2218 = vmatprep.subr.bf16.mxu1 %v6345_v29  ;;  %v6481_v29 = vld [vmem:[#allocation8 + $0xf0] ss:$12 sps:$4 sm:$0xff]  }
 0x124   :  { %2406 = vmatmul.mubr.bf16.vlgmr.msra.gmra.mrb[8].mxu0 %v7164_v40 }
 0x125   :  { %2098 = vmatmul.mubr.bf16.gmra.mrb[12].mxu1 %v7170_v51  ;;  %4542 = vmatpush1.bf16.msra.mxu0 %v6421_v47  ;;  %v6513_v47 = vld [vmem:[#allocation8 + $0x16c] ss:$12 sps:$4 sm:$0xff]  }
 0x126   :  { %2219 = vmatpush1.bf16.msra.mxu1 %v6343_v32  ;;  %2246 = vmatprep.mubr.bf16.mxu1 %v7148_v20  ;;  %v6432_v32 = vld [vmem:[#allocation5 + $0x67c] ss:$48 sps:$4 sm:$0xff]  }
 0x127   :  { %2220 = vmatprep.subr.bf16.mxu1 %v6351_v33  ;;  %4543 = vmatprep.subr.bf16.mxu0 %v6429_v48  ;;  %v6487_v33 = vld [vmem:[#allocation8 + $0x108] ss:$12 sps:$4 sm:$0xff]   ;;  %v6448_v48 = vld [vmem:[#allocation5 + $0x798] ss:$48 sps:$4 sm:$0xff]  }
 0x128   :  { %2415 = vmatprep.mubr.bf16.mxu0 %v7053_v18 }
 0x129   :  { %4544 = vmatpush1.bf16.msra.mxu0 %v6427_v52  ;;  %v6543_v52 = vld [vmem:[#allocation8 + $0x184] ss:$12 sps:$4 sm:$0xff]  }
 0x12a   :  { %2221 = vmatpush1.bf16.msra.mxu1 %v6349_v36  ;;  %4545 = vmatprep.subr.bf16.mxu0 %v6435_v53  ;;  %v6438_v36 = vld [vmem:[#allocation5 + $0x6dc] ss:$48 sps:$4 sm:$0xff]   ;;  %v6454_v53 = vld [vmem:[#allocation5 + $0x7f8] ss:$48 sps:$4 sm:$0xff]  }
 0x12b   :  { %2222 = vmatprep.subr.bf16.mxu1 %v6357_v37  ;;  %v6493_v37 = vld [vmem:[#allocation8 + $0x120] ss:$12 sps:$4 sm:$0xff]  }
 0x12c   :  { %2416 = vmatmul.mubr.bf16.gmra.mrb[12].mxu0 %v7170_v51 }
 0x12d   :  { %4546 = vmatpush1.bf16.msra.mxu0 %v6433_v56  ;;  %v6468_v56 = vld [vmem:[#allocation5 + $0x8bc] ss:$48 sps:$4 sm:$0xff]  }
 0x12e   :  { %2223 = vmatpush1.bf16.msra.mxu1 %v6355_v41  ;;  %4547 = vmatprep.subr.bf16.mxu0 %v6441_v57  ;;  %v6444_v41 = vld [vmem:[#allocation5 + $0x73c] ss:$48 sps:$4 sm:$0xff]   ;;  %v6466_v57 = vld [vmem:[#allocation5 + $0x8b8] ss:$48 sps:$4 sm:$0xff]  }
 0x12f   :  { %2224 = vmatprep.subr.bf16.mxu1 %v6363_v42  ;;  %v6499_v42 = vld [vmem:[#allocation8 + $0x138] ss:$12 sps:$4 sm:$0xff]  }
 0x131   :  { %4548 = vmatpush1.bf16.msra.mxu0 %v6439_v60  ;;  %v6480_v60 = vld [vmem:[#allocation5 + $0x8c] ss:$48 sps:$4 sm:$0xff]  }
 0x132   :  { %2225 = vmatpush1.bf16.msra.mxu1 %v6361_v45  ;;  %4549 = vmatprep.subr.bf16.mxu0 %v6447_v61  ;;  %v6450_v45 = vld [vmem:[#allocation5 + $0x79c] ss:$48 sps:$4 sm:$0xff]   ;;  %v6478_v61 = vld [vmem:[#allocation5 + $0x88] ss:$48 sps:$4 sm:$0xff]  }
 0x133   :  { %2226 = vmatprep.subr.bf16.mxu1 %v6369_v46  ;;  %v6505_v46 = vld [vmem:[#allocation8 + $0x150] ss:$12 sps:$4 sm:$0xff]  }
 0x135   :  { %4550 = vmatpush1.bf16.msra.mxu0 %v6445_v1  ;;  %v396_v1 = vlaneseq }
 0x136   :  { %2227 = vmatpush1.bf16.msra.mxu1 %v6367_v49  ;;  %4551 = vmatprep.subr.bf16.mxu0 %v6453_v3  ;;  %v6456_v49 = vld [vmem:[#allocation5 + $0x7fc] ss:$48 sps:$4 sm:$0xff]  }
 0x137   :  { %2228 = vmatprep.subr.bf16.mxu1 %v6375_v50  ;;  %v6511_v50 = vld [vmem:[#allocation8 + $0x168] ss:$12 sps:$4 sm:$0xff]   ;;  %v6492_v3 = vld [vmem:[#allocation5 + $0x14c] ss:$48 sps:$4 sm:$0xff]  }
 0x139   :  { %4552 = vmatpush1.bf16.msra.mxu0 %v6451_v6  ;;  %v7200_v6 = vshrl.u32 %v396_v1, 7  ;;  %v6528_v1 = vld [vmem:[#allocation5 + $0x44c] ss:$48 sps:$4 sm:$0xff]  }
 0x13a   :  { %2229 = vmatpush1.bf16.msra.mxu1 %v6373_v54  ;;  %4553 = vmatprep.subr.bf16.mxu0 %v6459_v7  ;;  %v6462_v54 = vld [vmem:[#allocation5 + $0x85c] ss:$48 sps:$4 sm:$0xff]   ;;  %v6496_v7 = vld [vmem:[#allocation5 + $0x1a8] ss:$48 sps:$4 sm:$0xff]  }
 0x13b   :  { %2230 = vmatprep.subr.bf16.mxu1 %v6381_v55  ;;  %v6460_v55 = vld [vmem:[#allocation5 + $0x858] ss:$48 sps:$4 sm:$0xff]  }
 0x13d   :  { %4554 = vmatpush1.bf16.msra.mxu0 %v6457_v10  ;;  %v6504_v10 = vld [vmem:[#allocation5 + $0x20c] ss:$48 sps:$4 sm:$0xff]  }
 0x13e   :  { %2231 = vmatpush1.bf16.msra.mxu1 %v6379_v58  ;;  %4555 = vmatprep.subr.bf16.mxu0 %v6465_v12  ;;  %v6474_v58 = vld [vmem:[#allocation5 + $0x2c] ss:$48 sps:$4 sm:$0xff]   ;;  %v7209_v12 = vsub.s32 1, %v7200_v6 }
 0x13f   :  { %2232 = vmatprep.subr.bf16.mxu1 %v6387_v59  ;;  %v6472_v59 = vld [vmem:[#allocation5 + $0x28] ss:$48 sps:$4 sm:$0xff]  }
 0x141   :  { %4556 = vmatpush1.bf16.msra.mxu0 %v6463_v15  ;;  %v6510_v15 = vld [vmem:[#allocation5 + $0x26c] ss:$48 sps:$4 sm:$0xff]  }
 0x142   :  { %2233 = vmatpush1.bf16.msra.mxu1 %v6385_v62  ;;  %4557 = vmatprep.subr.bf16.mxu0 %v6471_v16  ;;  %v6486_v62 = vld [vmem:[#allocation5 + $0xec] ss:$48 sps:$4 sm:$0xff]  }
 0x143   :  { %2234 = vmatprep.subr.bf16.mxu1 %v6393_v0  ;;  %v6484_v0 = vld [vmem:[#allocation5 + $0xe8] ss:$48 sps:$4 sm:$0xff]  }
 0x145   :  { %4558 = vmatpush1.bf16.msra.mxu0 %v6469_v21  ;;  %v6508_v21 = vld [vmem:[#allocation5 + $0x268] ss:$48 sps:$4 sm:$0xff]  }
 0x146   :  { %2235 = vmatpush1.bf16.msra.mxu1 %v6391_v4  ;;  %4559 = vmatprep.subr.bf16.mxu0 %v6477_v22  ;;  %v6490_v4 = vld [vmem:[#allocation5 + $0x148] ss:$48 sps:$4 sm:$0xff]   ;;  %v6516_v22 = vld [vmem:[#allocation5 + $0x2cc] ss:$48 sps:$4 sm:$0xff]  }
 0x147   :  { %2236 = vmatprep.subr.bf16.mxu1 %v6399_v5  ;;  %v6498_v5 = vld [vmem:[#allocation5 + $0x1ac] ss:$48 sps:$4 sm:$0xff]  }
 0x149   :  { %4560 = vmatpush1.bf16.msra.mxu0 %v6475_v25 }
 0x14a   :  { %2237 = vmatpush1.bf16.msra.mxu1 %v6397_v8  ;;  %4561 = vmatprep.subr.bf16.mxu0 %v6483_v26  ;;  %v7203_v8 = vld [vmem:[#allocation7] sm:$0xff] }
 0x14b   :  { %2238 = vmatprep.subr.bf16.mxu1 %v6405_v9  ;;  %v7206_v9 = vsub.s32 0, %v7200_v6 }
 0x14d   :  { %4562 = vmatpush1.bf16.msra.mxu0 %v6481_v29 }
 0x14e   :  { %2239 = vmatpush1.bf16.msra.mxu1 %v6403_v13  ;;  %4563 = vmatprep.subr.bf16.mxu0 %v6489_v31  ;;  %v6502_v13 = vld [vmem:[#allocation5 + $0x208] ss:$48 sps:$4 sm:$0xff]  }
 0x14f   :  { %2240 = vmatprep.subr.bf16.mxu1 %v6411_v14  ;;  %v399_v14 = vrot.slane %v7203_v8, %v7206_v9 }
 0x151   :  { %4564 = vmatpush1.bf16.msra.mxu0 %v6487_v33 }
 0x152   :  { %2241 = vmatpush1.bf16.msra.mxu1 %v6409_v17  ;;  %4565 = vmatprep.subr.bf16.mxu0 %v6495_v34 }
 0x153   :  { %2242 = vmatprep.subr.bf16.mxu1 %v6417_v19 }
 0x155   :  { %4566 = vmatpush1.bf16.msra.mxu0 %v6493_v37  ;;  %v6517_v37 = vld [vmem:[#allocation5 + $0x328] ss:$48 sps:$4 sm:$0xff]  }
 0x156   :  { %2243 = vmatpush1.bf16.msra.mxu1 %v6415_v23  ;;  %4567 = vmatprep.subr.bf16.mxu0 %v6501_v38  ;;  %v6541_v38 = vld [vmem:[#allocation8 + $0x180] ss:$12 sps:$4 sm:$0xff]  }
 0x157   :  { %2244 = vmatprep.subr.bf16.mxu1 %v6420_v24 }
 0x159   :  { %4568 = vmatpush1.bf16.msra.mxu0 %v6499_v42  ;;  %v6522_v42 = vld [vmem:[#allocation5 + $0x38c] ss:$48 sps:$4 sm:$0xff]  }
 0x15a   :  { %2245 = vmatpush1.bf16.msra.mxu1 %v6418_v27  ;;  %4569 = vmatprep.subr.bf16.mxu0 %v6507_v43  ;;  %v6549_v43 = vld [vmem:[#allocation8 + $0x19c] ss:$12 sps:$4 sm:$0xff]  }
 0x15b   :  { %2267 = vmatprep.subr.bf16.mxu1 %v6426_v28  ;;  %v6514_v28 = vld [vmem:[#allocation5 + $0x2c8] ss:$48 sps:$4 sm:$0xff]  }
 0x15d   :  { %2247 = vmatmul.mubr.bf16.vlgmr.msra.gmra.mrb[16].mxu1 %v7152_v63  ;;  %4570 = vmatpush1.bf16.msra.mxu0 %v6505_v46 }
 0x15e   :  { %2268 = vmatpush1.bf16.msra.mxu1 %v6424_v30  ;;  %2256 = vmatprep.mubr.bf16.mxu1 %v7154_v2 }
 0x15f   :  { %2269 = vmatprep.subr.bf16.mxu1 %v6432_v32  ;;  %4571 = vmatprep.subr.bf16.mxu0 %v6513_v47  ;;  %v6519_v32 = vld [vmem:[#allocation5 + $0x32c] ss:$48 sps:$4 sm:$0xff]  }
 0x161   :  { %4572 = vmatpush1.bf16.msra.mxu0 %v6511_v50  ;;  %v6547_v50 = vld [vmem:[#allocation8 + $0x198] ss:$12 sps:$4 sm:$0xff]  }
 0x162   :  { %2270 = vmatpush1.bf16.msra.mxu1 %v6430_v35  ;;  %4594 = vmatprep.subr.bf16.mxu0 %v6543_v52 }
 0x163   :  { %2271 = vmatprep.subr.bf16.mxu1 %v6438_v36 }
 0x165   :  { %2257 = vmatmul.mubr.bf16.gmra.mrb[20].mxu1 %v7158_v11 }
 0x166   :  { %2272 = vmatpush1.bf16.msra.mxu1 %v6436_v39  ;;  %2299 = vmatprep.mubr.bf16.mxu1 %v7053_v18 }
 0x167   :  { %2273 = vmatprep.subr.bf16.mxu1 %v6444_v41 }
 0x16a   :  { %2274 = vmatpush1.bf16.msra.mxu1 %v6442_v44 }
 0x16b   :  { %2275 = vmatprep.subr.bf16.mxu1 %v6450_v45 }
 0x16e   :  { %2276 = vmatpush1.bf16.msra.mxu1 %v6448_v48 }
 0x16f   :  { %2277 = vmatprep.subr.bf16.mxu1 %v6456_v49  ;;  %v6520_v49 = vld [vmem:[#allocation5 + $0x388] ss:$48 sps:$4 sm:$0xff]  }
 0x172   :  { %2278 = vmatpush1.bf16.msra.mxu1 %v6454_v53 }
 0x173   :  { %2279 = vmatprep.subr.bf16.mxu1 %v6462_v54  ;;  %v6525_v54 = vld [vmem:[#allocation5 + $0x3ec] ss:$48 sps:$4 sm:$0xff]  }
 0x176   :  { %2280 = vmatpush1.bf16.msra.mxu1 %v6460_v55  ;;  %v6555_v55 = vld [vmem:[#allocation8 + $0x1b4] ss:$12 sps:$4 sm:$0xff]  }
 0x177   :  { %2281 = vmatprep.subr.bf16.mxu1 %v6468_v56  ;;  %v414_v56 = vsub.s32 4, %v7200_v6 }
 0x17a   :  { %2282 = vmatpush1.bf16.msra.mxu1 %v6466_v57 }
 0x17b   :  { %2426 = vmatprep.subr.bf16.mxu1 %v6474_v58 }
 0x17d   :  { %2300 = vmatmul.mubr.bf16.vlgmr.msra.gmra.mrb[16].mxu1 %v7164_v40 }
 0x17e   :  { %2427 = vmatpush1.bf16.msra.mxu1 %v6472_v59  ;;  %2309 = vmatprep.mubr.bf16.mxu1 %v7053_v18  ;;  %v418_v59 = vsub.s32 5, %v7200_v6 }
 0x17f   :  { %2428 = vmatprep.subr.bf16.mxu1 %v6480_v60 }
 0x182   :  { %2429 = vmatpush1.bf16.msra.mxu1 %v6478_v61 }
 0x183   :  { %2430 = vmatprep.subr.bf16.mxu1 %v6486_v62  ;;  %v6523_v62 = vld [vmem:[#allocation5 + $0x3e8] ss:$48 sps:$4 sm:$0xff]  }
 0x185   :  { %2310 = vmatmul.mubr.bf16.gmra.mrb[20].mxu1 %v7170_v51 }
 0x186   :  { %2431 = vmatpush1.bf16.msra.mxu1 %v6484_v0  ;;  %2458 = vmatprep.mubr.bf16.mxu1 %v7148_v20  ;;  %v403_v20 = vrot.slane %v7203_v8, %v7209_v12  ;;  %v6553_v0 = vld [vmem:[#allocation8 + $0x1b0] ss:$12 sps:$4 sm:$0xff]  }
 0x187   :  { %2432 = vmatprep.subr.bf16.mxu1 %v6492_v3  ;;  %v6561_v3 = vld [vmem:[#allocation8 + $0x1cc] ss:$12 sps:$4 sm:$0xff]  }
 0x18a   :  { %2433 = vmatpush1.bf16.msra.mxu1 %v6490_v4  ;;  %v415_v4 = vrot.slane %v7203_v8, %v414_v56 }
 0x18b   :  { %2434 = vmatprep.subr.bf16.mxu1 %v6498_v5  ;;  %v419_v5 = vrot.slane %v7203_v8, %v418_v59  ;;  %v6583_v59 = vld [vmem:[#allocation8 + $0x228] ss:$12 sps:$4 sm:$0xff]  }
 0x18e   :  { %2435 = vmatpush1.bf16.msra.mxu1 %v6496_v7  ;;  %v6559_v7 = vld [vmem:[#allocation8 + $0x1c8] ss:$12 sps:$4 sm:$0xff]  }
 0x18f   :  { %2436 = vmatprep.subr.bf16.mxu1 %v6504_v10  ;;  %v6526_v10 = vld [vmem:[#allocation5 + $0x448] ss:$48 sps:$4 sm:$0xff]  }
 0x190   :  { %v1983_v16 = vpop.f32.mrb[0].mxu1 }
 0x191   :  { %v5928_v17 = vadd.f32 %v1983_v16, %v399_v14  ;;  %v1985_v19 = vpop.f32.mrb[1].mxu1 }
 0x192   :  { %v5929_v23 = vadd.f32 %v1985_v19, %v403_v20  ;;  %v1987_v24 = vpop.f32.mrb[2].mxu1  ;;  %2437 = vmatpush1.bf16.msra.mxu1 %v6502_v13  ;;  %v6567_v13 = vld [vmem:[#allocation8 + $0x1e4] ss:$12 sps:$4 sm:$0xff]  }
 0x193   :  { %v5930_v25 = vadd.f32 %v1987_v24, %v399_v14  ;;  %v1989_v26 = vpop.f32.mrb[3].mxu1  ;;  %2438 = vmatprep.subr.bf16.mxu1 %v6510_v15  ;;  %v2532_v29 = vmax.f32 %v5928_v17, 0.0  ;;  %v6531_v15 = vld [vmem:[#allocation5 + $0x4ac] ss:$48 sps:$4 sm:$0xff]  }
 0x194   :  { %v5931_v27 = vadd.f32 %v1989_v26, %v403_v20  ;;  %v2533_v30 = vmax.f32 %v5929_v23, 0.0 }
 0x195   :  { %v2544_v31 = vmax.f32 %v5930_v25, 0.0  ;;  %v6529_v25 = vld [vmem:[#allocation5 + $0x4a8] ss:$48 sps:$4 sm:$0xff]  }
 0x196   :  { %v2545_v33 = vmax.f32 %v5931_v27, 0.0  ;;  %2439 = vmatpush1.bf16.msra.mxu1 %v6508_v21  ;;  %v6565_v21 = vld [vmem:[#allocation8 + $0x1e0] ss:$12 sps:$4 sm:$0xff]  }
 0x197   :  { %v7215_v34 = vpack.c.bf16 %v2544_v31, %v2532_v29  ;;  %2440 = vmatprep.subr.bf16.mxu1 %v6516_v22  ;;  %v6534_v29 = vld [vmem:[#allocation5 + $0x50c] ss:$48 sps:$4 sm:$0xff]  }
 0x198   :  { %v7217_v35 = vpack.c.bf16 %v2545_v33, %v2533_v30  ;;  %v1993_v36 = vpop.f32.mrb[4].mxu1 }
 0x199   :  { %v5932_v39 = vadd.f32 %v1993_v36, %v399_v14  ;;  %v1995_v41 = vpop.f32.mrb[5].mxu1  ;;  %v6571_v36 = vld [vmem:[#allocation8 + $0x1f8] ss:$12 sps:$4 sm:$0xff]  }
 0x19a   :  { %v5933_v44 = vadd.f32 %v1995_v41, %v403_v20  ;;  %v1997_v45 = vpop.f32.mrb[6].mxu1  ;;  %2441 = vmatpush1.bf16.msra.mxu1 %v6514_v28  ;;  %4573 = vmatprep.mubr.bf16.mxu0 %v7217_v35  ;;  %v6573_v28 = vld [vmem:[#allocation8 + $0x1fc] ss:$12 sps:$4 sm:$0xff]  }
 0x19b   :  { %v5934_v46 = vadd.f32 %v1997_v45, %v399_v14  ;;  %v1999_v47 = vpop.f32.mrb[7].mxu1  ;;  %4574 = vmatmul.mubr.bf16.vlgmr.msra.gmra.mrb[16].mxu0 %v7215_v34  ;;  %2442 = vmatprep.subr.bf16.mxu1 %v6519_v32  ;;  %v2556_v52 = vmax.f32 %v5932_v39, 0.0  ;;  %v2195_v14 = vpop.f32.mrb[0].mxu0  ;;  %v6532_v32 = vld [vmem:[#allocation5 + $0x508] ss:$48 sps:$4 sm:$0xff]  }
 0x19c   :  { %v5935_v48 = vadd.f32 %v1999_v47, %v403_v20  ;;  %4595 = vmatpush1.bf16.msra.mxu0 %v6541_v38  ;;  %v2557_v57 = vmax.f32 %v5933_v44, 0.0  ;;  %v5944_v20 = vadd.f32 %v2195_v14, %v415_v4  ;;  %v2197_v16 = vpop.f32.mrb[1].mxu0  ;;  %v6579_v39 = vld [vmem:[#allocation8 + $0x214] ss:$12 sps:$4 sm:$0xff]   ;;  %v6577_v47 = vld [vmem:[#allocation8 + $0x210] ss:$12 sps:$4 sm:$0xff]  }
 0x19d   :  { %v2568_v53 = vmax.f32 %v5934_v46, 0.0  ;;  %4596 = vmatprep.subr.bf16.mxu0 %v6549_v43  ;;  %v5945_v17 = vadd.f32 %v2197_v16, %v419_v5  ;;  %v2199_v19 = vpop.f32.mrb[2].mxu0  ;;  %v6535_v46 = vld [vmem:[#allocation5 + $0x568] ss:$48 sps:$4 sm:$0xff]  }
 0x19e   :  { %v2569_v58 = vmax.f32 %v5935_v48, 0.0  ;;  %2443 = vmatpush1.bf16.msra.mxu1 %v6517_v37  ;;  %v2536_v22 = vmax.f32 %v5944_v20, 0.0  ;;  %v5946_v23 = vadd.f32 %v2199_v19, %v415_v4  ;;  %v2201_v24 = vpop.f32.mrb[3].mxu0  ;;  %v6537_v37 = vld [vmem:[#allocation5 + $0x56c] ss:$48 sps:$4 sm:$0xff]  }
 0x19f   :  { %v7223_v60 = vpack.c.bf16 %v2568_v53, %v2556_v52  ;;  %2444 = vmatprep.subr.bf16.mxu1 %v6522_v42  ;;  %v2537_v26 = vmax.f32 %v5945_v17, 0.0  ;;  %v5947_v27 = vadd.f32 %v2201_v24, %v419_v5  ;;  %v2205_v41 = vpop.f32.mrb[4].mxu0  ;;  %v6540_v52 = vld [vmem:[#allocation5 + $0x5cc] ss:$48 sps:$4 sm:$0xff]   ;;  %v6585_v53 = vld [vmem:[#allocation8 + $0x22c] ss:$12 sps:$4 sm:$0xff]  }
 0x1a0   :  { %v7225_v61 = vpack.c.bf16 %v2569_v58, %v2557_v57  ;;  %4597 = vmatpush1.bf16.msra.mxu0 %v6547_v50  ;;  %v2548_v30 = vmax.f32 %v5946_v23, 0.0  ;;  %v5948_v42 = vadd.f32 %v2205_v41, %v415_v4  ;;  %v2207_v43 = vpop.f32.mrb[5].mxu0  ;;  %v6538_v58 = vld [vmem:[#allocation5 + $0x5c8] ss:$48 sps:$4 sm:$0xff]   ;;  %v6600_v20 = vld [vmem:[#allocation8 + $0x274] ss:$12 sps:$4 sm:$0xff]  }
 0x1a1   :  { %4598 = vmatprep.subr.bf16.mxu0 %v6555_v55  ;;  %v2549_v31 = vmax.f32 %v5947_v27, 0.0  ;;  %v5949_v44 = vadd.f32 %v2207_v43, %v419_v5  ;;  %v2209_v45 = vpop.f32.mrb[6].mxu0  ;;  %v6550_v14 = vld [vmem:[#allocation5 + $0x688] ss:$48 sps:$4 sm:$0xff]   ;;  %v6610_v24 = vld [vmem:[#allocation8 + $0x2a4] ss:$12 sps:$4 sm:$0xff]  }
 0x1a2   :  { %2445 = vmatpush1.bf16.msra.mxu1 %v6520_v49  ;;  %4583 = vmatprep.mubr.bf16.mxu0 %v7225_v61  ;;  %v7231_v33 = vpack.c.bf16 %v2548_v30, %v2536_v22  ;;  %v2560_v48 = vmax.f32 %v5948_v42, 0.0  ;;  %v5950_v49 = vadd.f32 %v2209_v45, %v415_v4  ;;  %v2211_v50 = vpop.f32.mrb[7].mxu0  ;;  %v6589_v4 = vld [vmem:[#allocation8 + $0x240] ss:$12 sps:$4 sm:$0xff]   ;;  %v6598_v16 = vld [vmem:[#allocation8 + $0x270] ss:$12 sps:$4 sm:$0xff]  }
 0x1a3   :  { %4584 = vmatmul.mubr.bf16.gmra.mrb[20].mxu0 %v7223_v60  ;;  %2446 = vmatprep.subr.bf16.mxu1 %v6525_v54  ;;  %v7233_v38 = vpack.c.bf16 %v2549_v31, %v2537_v26  ;;  %v2561_v54 = vmax.f32 %v5949_v44, 0.0  ;;  %v5951_v55 = vadd.f32 %v2211_v50, %v419_v5  ;;  %v6595_v5 = vld [vmem:[#allocation8 + $0x25c] ss:$12 sps:$4 sm:$0xff]   ;;  %v6605_v19 = vld [vmem:[#allocation8 + $0x28c] ss:$12 sps:$4 sm:$0xff]  }
 0x1a4   :  { %4599 = vmatpush1.bf16.msra.mxu0 %v6553_v0  ;;  %v2572_v56 = vmax.f32 %v5950_v49, 0.0  ;;  %v6546_v0 = vld [vmem:[#allocation5 + $0x62c] ss:$48 sps:$4 sm:$0xff]   ;;  %v6556_v17 = vld [vmem:[#allocation5 + $0x6e8] ss:$48 sps:$4 sm:$0xff]  }
 0x1a5   :  { %4600 = vmatprep.subr.bf16.mxu0 %v6561_v3  ;;  %v2573_v57 = vmax.f32 %v5951_v55, 0.0  ;;  %v6603_v22 = vld [vmem:[#allocation8 + $0x288] ss:$12 sps:$4 sm:$0xff]   ;;  %v6562_v23 = vld [vmem:[#allocation5 + $0x748] ss:$48 sps:$4 sm:$0xff]  }
 0x1a6   :  { %2447 = vmatpush1.bf16.msra.mxu1 %v6523_v62  ;;  %v7235_v62 = vpack.c.bf16 %v2572_v56, %v2560_v48  ;;  %v6576_v26 = vld [vmem:[#allocation5 + $0x80c] ss:$48 sps:$4 sm:$0xff]   ;;  %v6615_v27 = vld [vmem:[#allocation8 + $0x2bc] ss:$12 sps:$4 sm:$0xff]   ;;  %v6606_v48 = vld [vmem:[#allocation8 + $0x38] ss:$12 sps:$4 sm:$0xff]  }
 0x1a7   :  { %2448 = vmatprep.subr.bf16.mxu1 %v6528_v1  ;;  %v6591_v1 = vld [vmem:[#allocation8 + $0x244] ss:$12 sps:$4 sm:$0xff]   ;;  %v7237_v3 = vpack.c.bf16 %v2573_v57, %v2561_v54  ;;  %v6586_v41 = vld [vmem:[#allocation5 + $0x8c8] ss:$48 sps:$4 sm:$0xff]   ;;  %v6592_v43 = vld [vmem:[#allocation8 + $0xc8] ss:$12 sps:$4 sm:$0xff]  }
 0x1a8   :  { %4601 = vmatpush1.bf16.msra.mxu0 %v6559_v7  ;;  %v6544_v7 = vld [vmem:[#allocation5 + $0x628] ss:$48 sps:$4 sm:$0xff]   ;;  %v6582_v30 = vld [vmem:[#allocation5 + $0x86c] ss:$48 sps:$4 sm:$0xff]   ;;  %v6596_v44 = vld [vmem:[#allocation8 + $0x8] ss:$12 sps:$4 sm:$0xff]  }
 0x1a9   :  { %4602 = vmatprep.subr.bf16.mxu0 %v6567_v13  ;;  %v6593_v13 = vld [vmem:[#allocation8 + $0x258] ss:$12 sps:$4 sm:$0xff]   ;;  %v6618_v31 = vld [vmem:[#allocation8 + $0x2d0] ss:$12 sps:$4 sm:$0xff]   ;;  %v6597_v45 = vld [vmem:[#allocation8 + $0xe0] ss:$12 sps:$4 sm:$0xff]  }
 0x1aa   :  { %2449 = vmatpush1.bf16.msra.mxu1 %v6526_v10  ;;  %v6552_v10 = vld [vmem:[#allocation5 + $0x68c] ss:$48 sps:$4 sm:$0xff]   ;;  %v6622_v56 = vld [vmem:[#allocation8 + $0x158] ss:$12 sps:$4 sm:$0xff]  }
 0x1ab   :  { %2450 = vmatprep.subr.bf16.mxu1 %v6531_v15  ;;  %v6558_v15 = vld [vmem:[#allocation5 + $0x6ec] ss:$48 sps:$4 sm:$0xff]  }
 0x1ac   :  { %4603 = vmatpush1.bf16.msra.mxu0 %v6565_v21  ;;  %v6564_v21 = vld [vmem:[#allocation5 + $0x74c] ss:$48 sps:$4 sm:$0xff]  }
 0x1ad   :  { %4604 = vmatprep.subr.bf16.mxu0 %v6573_v28  ;;  %v6574_v28 = vld [vmem:[#allocation5 + $0x808] ss:$48 sps:$4 sm:$0xff]   ;;  %v6630_v42 = vld [vmem:[#allocation8 + $0x304] ss:$12 sps:$4 sm:$0xff]  }
 0x1ae   :  { %2451 = vmatpush1.bf16.msra.mxu1 %v6529_v25  ;;  %v6608_v25 = vld [vmem:[#allocation8 + $0x2a0] ss:$12 sps:$4 sm:$0xff]   ;;  %v6607_v49 = vld [vmem:[#allocation8 + $0x110] ss:$12 sps:$4 sm:$0xff]  }
 0x1af   :  { %2452 = vmatprep.subr.bf16.mxu1 %v6534_v29  ;;  %v6613_v29 = vld [vmem:[#allocation8 + $0x2b8] ss:$12 sps:$4 sm:$0xff]   ;;  %v6611_v50 = vld [vmem:[#allocation8 + $0x50] ss:$12 sps:$4 sm:$0xff]   ;;  %v6617_v54 = vld [vmem:[#allocation8 + $0x140] ss:$12 sps:$4 sm:$0xff]  }
 0x1b0   :  { %4605 = vmatpush1.bf16.msra.mxu0 %v6571_v36  ;;  %v6625_v36 = vld [vmem:[#allocation8 + $0x2ec] ss:$12 sps:$4 sm:$0xff]  }
 0x1b1   :  { %4606 = vmatprep.subr.bf16.mxu0 %v6579_v39  ;;  %v6623_v39 = vld [vmem:[#allocation8 + $0x2e8] ss:$12 sps:$4 sm:$0xff]  }
 0x1b2   :  { %2453 = vmatpush1.bf16.msra.mxu1 %v6532_v32  ;;  %v6580_v32 = vld [vmem:[#allocation5 + $0x868] ss:$48 sps:$4 sm:$0xff]  }
 0x1b3   :  { %2454 = vmatprep.subr.bf16.mxu1 %v6537_v37  ;;  %v6588_v37 = vld [vmem:[#allocation5 + $0x8cc] ss:$48 sps:$4 sm:$0xff]  }
 0x1b4   :  { %4607 = vmatpush1.bf16.msra.mxu0 %v6577_v47  ;;  %v6602_v47 = vld [vmem:[#allocation8 + $0xf8] ss:$12 sps:$4 sm:$0xff]  }
 0x1b5   :  { %4608 = vmatprep.subr.bf16.mxu0 %v6585_v53  ;;  %v6616_v53 = vld [vmem:[#allocation8 + $0x68] ss:$12 sps:$4 sm:$0xff]  }
 0x1b6   :  { %2455 = vmatpush1.bf16.msra.mxu1 %v6535_v46  ;;  %v6601_v46 = vld [vmem:[#allocation8 + $0x20] ss:$12 sps:$4 sm:$0xff]  }
 0x1b7   :  { %2456 = vmatprep.subr.bf16.mxu1 %v6540_v52  ;;  %v6612_v52 = vld [vmem:[#allocation8 + $0x128] ss:$12 sps:$4 sm:$0xff]  }
 0x1b8   :  { %4609 = vmatpush1.bf16.msra.mxu0 %v6583_v59 }
 0x1b9   :  { %4610 = vmatprep.subr.bf16.mxu0 %v6591_v1 }
 0x1ba   :  { %2457 = vmatpush1.bf16.msra.mxu1 %v6538_v58 }
 0x1bb   :  { %2479 = vmatprep.subr.bf16.mxu1 %v6546_v0 }
 0x1bc   :  { %4611 = vmatpush1.bf16.msra.mxu0 %v6589_v4  ;;  %v6626_v4 = vld [vmem:[#allocation8 + $0x98] ss:$12 sps:$4 sm:$0xff]  }
 0x1bd   :  { %2459 = vmatmul.mubr.bf16.vlgmr.msra.gmra.mrb[24].mxu1 %v7152_v63  ;;  %4612 = vmatprep.subr.bf16.mxu0 %v6595_v5  ;;  %v6570_v63 = vld [vmem:[#allocation5 + $0x7ac] ss:$48 sps:$4 sm:$0xff]  }
 0x1be   :  { %2480 = vmatpush1.bf16.msra.mxu1 %v6544_v7  ;;  %2468 = vmatprep.mubr.bf16.mxu1 %v7154_v2  ;;  %v6568_v2 = vld [vmem:[#allocation5 + $0x7a8] ss:$48 sps:$4 sm:$0xff]  }
 0x1bf   :  { %2481 = vmatprep.subr.bf16.mxu1 %v6552_v10  ;;  %v6627_v10 = vld [vmem:[#allocation8 + $0x170] ss:$12 sps:$4 sm:$0xff]  }
 0x1c0   :  { %4613 = vmatpush1.bf16.msra.mxu0 %v6593_v13 }
 0x1c1   :  { %4614 = vmatprep.subr.bf16.mxu0 %v6600_v20 }
 0x1c2   :  { %2482 = vmatpush1.bf16.msra.mxu1 %v6550_v14 }
 0x1c3   :  { %2483 = vmatprep.subr.bf16.mxu1 %v6558_v15 }
 0x1c4   :  { %4615 = vmatpush1.bf16.msra.mxu0 %v6598_v16 }
 0x1c5   :  { %2469 = vmatmul.mubr.bf16.gmra.mrb[28].mxu1 %v7158_v11  ;;  %4616 = vmatprep.subr.bf16.mxu0 %v6605_v19  ;;  %v6620_v11 = vld [vmem:[#allocation8 + $0x2d4] ss:$12 sps:$4 sm:$0xff]  }
 0x1c6   :  { %2484 = vmatpush1.bf16.msra.mxu1 %v6556_v17  ;;  %2511 = vmatprep.mubr.bf16.mxu1 %v7053_v18  ;;  %v6632_v19 = vld [vmem:[#allocation8 + $0x248] ss:$12 sps:$4 sm:$0xff]  }
 0x1c7   :  { %2485 = vmatprep.subr.bf16.mxu1 %v6564_v21 }
 0x1c8   :  { %4617 = vmatpush1.bf16.msra.mxu0 %v6603_v22 }
 0x1c9   :  { %4618 = vmatprep.subr.bf16.mxu0 %v6610_v24 }
 0x1ca   :  { %2486 = vmatpush1.bf16.msra.mxu1 %v6562_v23  ;;  %v6628_v23 = vld [vmem:[#allocation8 + $0x300] ss:$12 sps:$4 sm:$0xff]  }
 0x1cb   :  { %2487 = vmatprep.subr.bf16.mxu1 %v6570_v63 }
 0x1cc   :  { %4619 = vmatpush1.bf16.msra.mxu0 %v6608_v25 }
 0x1cd   :  { %4620 = vmatprep.subr.bf16.mxu0 %v6615_v27  ;;  %v6636_v27 = vld [vmem:[#allocation8 + $0x188] ss:$12 sps:$4 sm:$0xff]  }
 0x1ce   :  { %2488 = vmatpush1.bf16.msra.mxu1 %v6568_v2  ;;  %v6635_v2 = vld [vmem:[#allocation8 + $0x31c] ss:$12 sps:$4 sm:$0xff]  }
 0x1cf   :  { %2489 = vmatprep.subr.bf16.mxu1 %v6576_v26 }
 0x1d0   :  { %4621 = vmatpush1.bf16.msra.mxu0 %v6613_v29 }
 0x1d1   :  { %4622 = vmatprep.subr.bf16.mxu0 %v6620_v11 }
 0x1d2   :  { %2490 = vmatpush1.bf16.msra.mxu1 %v6574_v28 }
 0x1d3   :  { %2491 = vmatprep.subr.bf16.mxu1 %v6582_v30  ;;  %v6637_v30 = vld [vmem:[#allocation8 + $0x260] ss:$12 sps:$4 sm:$0xff]  }
 0x1d4   :  { %4623 = vmatpush1.bf16.msra.mxu0 %v6618_v31  ;;  %v6633_v31 = vld [vmem:[#allocation8 + $0x318] ss:$12 sps:$4 sm:$0xff]  }
 0x1d5   :  { %4624 = vmatprep.subr.bf16.mxu0 %v6625_v36 }
 0x1d6   :  { %2492 = vmatpush1.bf16.msra.mxu1 %v6580_v32 }
 0x1d7   :  { %2493 = vmatprep.subr.bf16.mxu1 %v6588_v37  ;;  %v6640_v37 = vld [vmem:[#allocation8 + $0x334] ss:$12 sps:$4 sm:$0xff]  }
 0x1d8   :  { %4625 = vmatpush1.bf16.msra.mxu0 %v6623_v39 }
 0x1d9   :  { %4647 = vmatprep.subr.bf16.mxu0 %v6630_v42  ;;  %v6641_v42 = vld [vmem:[#allocation8 + $0x1a0] ss:$12 sps:$4 sm:$0xff]  }
 0x1da   :  { %2494 = vmatpush1.bf16.msra.mxu1 %v6586_v41 }
 0x1db   :  { %5760 = vmatprep.subr.bf16.mxu1 %v6592_v43 }
 0x1dd   :  { %2512 = vmatmul.mubr.bf16.vlgmr.msra.gmra.mrb[24].mxu1 %v7164_v40  ;;  %v7248_v40 = vsub.s32 2, %v7200_v6 }
 0x1de   :  { %5761 = vmatpush3.bf16.msra.mxu1 %v6596_v44  ;;  %2521 = vmatprep.mubr.bf16.mxu1 %v7053_v18  ;;  %v410_v18 = vsub.s32 3, %v7200_v6  ;;  %v6642_v44 = vld [vmem:[#allocation8 + $0x278] ss:$12 sps:$4 sm:$0xff]  }
 0x1df   :  { %5762 = vmatprep.subr.bf16.mxu1 %v6597_v45  ;;  %v407_v55 = vrot.slane %v7203_v8, %v7248_v40  ;;  %v7263_v45 = vld [vmem:[#allocation7 + $0x8] sm:$0xf] }
 0x1e2   :  { %5763 = vmatpush3.bf16.msra.mxu1 %v6601_v46 }
 0x1e3   :  { %5764 = vmatprep.subr.bf16.mxu1 %v6602_v47  ;;  %v6638_v47 = vld [vmem:[#allocation8 + $0x330] ss:$12 sps:$4 sm:$0xff]  }
 0x1e5   :  { %2522 = vmatmul.mubr.bf16.gmra.mrb[28].mxu1 %v7170_v51  ;;  %v411_v51 = vrot.slane %v7203_v8, %v410_v18  ;;  %v6631_v8 = vld [vmem:[#allocation8 + $0xb0] ss:$12 sps:$4 sm:$0xff]  }
 0x1e6   :  { %5765 = vmatpush3.bf16.msra.mxu1 %v6606_v48  ;;  %4891 = vmatprep.mubr.bf16.mxu1 %v7217_v35  ;;  %v6621_v35 = vld [vmem:[#allocation8 + $0x80] ss:$12 sps:$4 sm:$0xff]   ;;  %v6646_v48 = vld [vmem:[#allocation8 + $0x1b8] ss:$12 sps:$4 sm:$0xff]  }
 0x1e7   :  { %5766 = vmatprep.subr.bf16.mxu1 %v6607_v49  ;;  %v6647_v49 = vld [vmem:[#allocation8 + $0x290] ss:$12 sps:$4 sm:$0xff]  }
 0x1ea   :  { %5767 = vmatpush3.bf16.msra.mxu1 %v6611_v50  ;;  %v435_v50 = vrot.slane %v7263_v45, %v7209_v12 }
 0x1eb   :  { %5768 = vmatprep.subr.bf16.mxu1 %v6612_v52  ;;  %v6643_v52 = vld [vmem:[#allocation8 + $0x348] ss:$12 sps:$4 sm:$0xff]  }
 0x1ee   :  { %5769 = vmatpush3.bf16.msra.mxu1 %v6616_v53  ;;  %v6650_v53 = vld [vmem:[#allocation8 + $0x364] ss:$12 sps:$4 sm:$0xff]  }
 0x1ef   :  { %5770 = vmatprep.subr.bf16.mxu1 %v6617_v54 }
 0x1f0   :  { %v2089_v57 = vpop.f32.mrb[8].mxu1 }
 0x1f1   :  { %v5936_v58 = vadd.f32 %v2089_v57, %v407_v55  ;;  %v2091_v59 = vpop.f32.mrb[9].mxu1 }
 0x1f2   :  { %v5937_v0 = vadd.f32 %v2091_v59, %v411_v51  ;;  %v2093_v1 = vpop.f32.mrb[10].mxu1  ;;  %5771 = vmatpush3.bf16.msra.mxu1 %v6621_v35  ;;  %v6648_v59 = vld [vmem:[#allocation8 + $0x360] ss:$12 sps:$4 sm:$0xff]  }
 0x1f3   :  { %v5938_v7 = vadd.f32 %v2093_v1, %v407_v55  ;;  %v2095_v5 = vpop.f32.mrb[11].mxu1  ;;  %5772 = vmatprep.subr.bf16.mxu1 %v6622_v56  ;;  %v2534_v14 = vmax.f32 %v5936_v58, 0.0  ;;  %v6652_v56 = vld [vmem:[#allocation8 + $0x2a8] ss:$12 sps:$4 sm:$0xff]  }
 0x1f4   :  { %v5939_v13 = vadd.f32 %v2095_v5, %v411_v51  ;;  %v2535_v20 = vmax.f32 %v5937_v0, 0.0 }
 0x1f5   :  { %v2546_v15 = vmax.f32 %v5938_v7, 0.0  ;;  %v6655_v7 = vld [vmem:[#allocation8 + $0x37c] ss:$12 sps:$4 sm:$0xff]  }
 0x1f6   :  { %v2547_v16 = vmax.f32 %v5939_v13, 0.0  ;;  %5773 = vmatpush3.bf16.msra.mxu1 %v6626_v4 }
 0x1f7   :  { %v7256_v17 = vpack.c.bf16 %v2546_v15, %v2534_v14  ;;  %5774 = vmatprep.subr.bf16.mxu1 %v6627_v10  ;;  %v2407_v54 = vpop.f32.mrb[8].mxu0  ;;  %v6656_v10 = vld [vmem:[#allocation8 + $0x1e8] ss:$12 sps:$4 sm:$0xff]   ;;  %v6657_v14 = vld [vmem:[#allocation8 + $0x2c0] ss:$12 sps:$4 sm:$0xff]  }
 0x1f8   :  { %v2583_v21 = vpack.c.bf16 %v2547_v16, %v2535_v20  ;;  %v2099_v22 = vpop.f32.mrb[12].mxu1  ;;  %v2409_v35 = vpop.f32.mrb[9].mxu0  ;;  %v6653_v20 = vld [vmem:[#allocation8 + $0x378] ss:$12 sps:$4 sm:$0xff]  }
 0x1f9   :  { %v5940_v63 = vadd.f32 %v2099_v22, %v407_v55  ;;  %v2101_v24 = vpop.f32.mrb[13].mxu1  ;;  %v5961_v57 = vadd.f32 %v2409_v35, %v435_v50  ;;  %v2411_v58 = vpop.f32.mrb[10].mxu0  ;;  %v6661_v22 = vld [vmem:[#allocation8 + $0x200] ss:$12 sps:$4 sm:$0xff]   ;;  %v6678_v35 = vld [vmem:[#allocation8 + $0x3f0] ss:$12 sps:$4 sm:$0xff]  }
 0x1fa   :  { %v5941_v25 = vadd.f32 %v2101_v24, %v411_v51  ;;  %v2103_v26 = vpop.f32.mrb[14].mxu1  ;;  %4626 = vmatprep.mubr.bf16.mxu0 %v2583_v21  ;;  %5775 = vmatpush3.bf16.msra.mxu1 %v6631_v8  ;;  %v2413_v4 = vpop.f32.mrb[11].mxu0  ;;  %v6660_v8 = vld [vmem:[#allocation8 + $0x394] ss:$12 sps:$4 sm:$0xff]   ;;  %v6662_v24 = vld [vmem:[#allocation8 + $0x2d8] ss:$12 sps:$4 sm:$0xff]  }
 0x1fb   :  { %v5942_v28 = vadd.f32 %v2103_v26, %v407_v55  ;;  %v2105_v29 = vpop.f32.mrb[15].mxu1  ;;  %4627 = vmatmul.mubr.bf16.vlgmr.msra.gmra.mrb[16].mxu0 %v7256_v17  ;;  %5788 = vmatprep.subr.bf16.mxu1 %v6632_v19  ;;  %v2558_v32 = vmax.f32 %v5940_v63, 0.0  ;;  %v6651_v55 = vld [vmem:[#allocation8 + $0x1d0] ss:$12 sps:$4 sm:$0xff]   ;;  %v5963_v5 = vadd.f32 %v2413_v4, %v435_v50 }
 0x1fc   :  { %v5943_v11 = vadd.f32 %v2105_v29, %v411_v51  ;;  %4648 = vmatpush1.bf16.msra.mxu0 %v6628_v23  ;;  %v2559_v39 = vmax.f32 %v5941_v25, 0.0  ;;  %v6658_v26 = vld [vmem:[#allocation8 + $0x390] ss:$12 sps:$4 sm:$0xff]  }
 0x1fd   :  { %v2570_v36 = vmax.f32 %v5942_v28, 0.0  ;;  %4892 = vmatmul.mubr.bf16.vlgmr.msra.gmra.mrb[32].mxu1 %v7215_v34  ;;  %4649 = vmatprep.subr.bf16.mxu0 %v6635_v2  ;;  %v6645_v34 = vld [vmem:[#allocation8 + $0x34c] ss:$12 sps:$4 sm:$0xff]   ;;  %v2553_v15 = vmax.f32 %v5963_v5, 0.0  ;;  %v6695_v4 = vld [vmem:[#allocation8 + $0x43c] ss:$12 sps:$4 sm:$0xff]  }
 0x1fe   :  { %v2571_v41 = vmax.f32 %v5943_v11, 0.0  ;;  %4899 = vmatprep.mubr.bf16.mxu1 %v7225_v61  ;;  %5789 = vmatpush3.bf16.msra.mxu1 %v6636_v27  ;;  %v431_v61 = vrot.slane %v7263_v45, %v7206_v9  ;;  %v6693_v5 = vld [vmem:[#allocation8 + $0x438] ss:$12 sps:$4 sm:$0xff]  }
 0x1ff   :  { %v7261_v43 = vpack.c.bf16 %v2570_v36, %v2558_v32  ;;  %5790 = vmatprep.subr.bf16.mxu1 %v6637_v30  ;;  %v6665_v30 = vld [vmem:[#allocation8 + $0x3ac] ss:$12 sps:$4 sm:$0xff]  }
 0x200   :  { %v7265_v46 = vpack.c.bf16 %v2571_v41, %v2559_v39  ;;  %4650 = vmatpush1.bf16.msra.mxu0 %v6633_v31  ;;  %v5960_v51 = vadd.f32 %v2407_v54, %v431_v61  ;;  %v5962_v1 = vadd.f32 %v2411_v58, %v431_v61  ;;  %v6666_v32 = vld [vmem:[#allocation8 + $0x218] ss:$12 sps:$4 sm:$0xff]   ;;  %v6663_v41 = vld [vmem:[#allocation8 + $0x3a8] ss:$12 sps:$4 sm:$0xff]   ;;  %v6687_v58 = vld [vmem:[#allocation8 + $0x410] ss:$12 sps:$4 sm:$0xff]  }
 0x201   :  { %4651 = vmatprep.subr.bf16.mxu0 %v6640_v37  ;;  %v6667_v37 = vld [vmem:[#allocation8 + $0x2f0] ss:$12 sps:$4 sm:$0xff]   ;;  %v6680_v54 = vld [vmem:[#allocation8 + $0x3f4] ss:$12 sps:$4 sm:$0xff]  }
 0x202   :  { %4636 = vmatprep.mubr.bf16.mxu0 %v7265_v46  ;;  %5791 = vmatpush3.bf16.msra.mxu1 %v6641_v42  ;;  %v2540_v0 = vmax.f32 %v5960_v51, 0.0  ;;  %v2552_v13 = vmax.f32 %v5962_v1, 0.0  ;;  %v6682_v51 = vld [vmem:[#allocation8 + $0x3f8] ss:$12 sps:$4 sm:$0xff]   ;;  %v6688_v1 = vld [vmem:[#allocation8 + $0x420] ss:$12 sps:$4 sm:$0xff]  }
 0x203   :  { %4637 = vmatmul.mubr.bf16.gmra.mrb[20].mxu0 %v7261_v43  ;;  %5792 = vmatprep.subr.bf16.mxu1 %v6642_v44  ;;  %v6670_v44 = vld [vmem:[#allocation8 + $0x3c4] ss:$12 sps:$4 sm:$0xff]  }
 0x204   :  { %4652 = vmatpush1.bf16.msra.mxu0 %v6638_v47  ;;  %4679 = vmatprep.mubr.bf16.mxu0 %v7233_v38  ;;  %v7275_v16 = vpack.c.bf16 %v2552_v13, %v2540_v0  ;;  %v6692_v0 = vld [vmem:[#allocation8 + $0x428] ss:$12 sps:$4 sm:$0xff]   ;;  %v6702_v13 = vld [vmem:[#allocation8 + $0x458] ss:$12 sps:$4 sm:$0xff]  }
 0x205   :  { %4900 = vmatmul.mubr.bf16.gmra.mrb[36].mxu1 %v7223_v60  ;;  %4653 = vmatprep.subr.bf16.mxu0 %v6645_v34  ;;  %v2541_v60 = vmax.f32 %v5961_v57, 0.0  ;;  %v6671_v34 = vld [vmem:[#allocation8 + $0x230] ss:$12 sps:$4 sm:$0xff]   ;;  %v6686_v57 = vld [vmem:[#allocation8 + $0x338] ss:$12 sps:$4 sm:$0xff]  }
 0x206   :  { %5793 = vmatpush3.bf16.msra.mxu1 %v6646_v48  ;;  %4940 = vmatprep.mubr.bf16.mxu1 %v2583_v21  ;;  %v2417_v21 = vpop.f32.mrb[12].mxu0  ;;  %v6672_v48 = vld [vmem:[#allocation8 + $0x3c8] ss:$12 sps:$4 sm:$0xff]  }
 0x207   :  { %5794 = vmatprep.subr.bf16.mxu1 %v6647_v49  ;;  %v7277_v19 = vpack.c.bf16 %v2553_v15, %v2541_v60  ;;  %v5964_v23 = vadd.f32 %v2417_v21, %v431_v61  ;;  %v2419_v63 = vpop.f32.mrb[13].mxu0  ;;  %v6675_v49 = vld [vmem:[#allocation8 + $0x3dc] ss:$12 sps:$4 sm:$0xff]   ;;  %v6697_v60 = vld [vmem:[#allocation8 + $0x440] ss:$12 sps:$4 sm:$0xff]  }
 0x208   :  { %4654 = vmatpush1.bf16.msra.mxu0 %v6643_v52  ;;  %v5965_v2 = vadd.f32 %v2419_v63, %v435_v50  ;;  %v2421_v25 = vpop.f32.mrb[14].mxu0  ;;  %v6677_v52 = vld [vmem:[#allocation8 + $0x3e0] ss:$12 sps:$4 sm:$0xff]   ;;  %v6706_v15 = vld [vmem:[#allocation8 + $0x398] ss:$12 sps:$4 sm:$0xff]  }
 0x209   :  { %4655 = vmatprep.subr.bf16.mxu0 %v6650_v53  ;;  %v2564_v27 = vmax.f32 %v5964_v23, 0.0  ;;  %v5966_v28 = vadd.f32 %v2421_v25, %v431_v61  ;;  %v2423_v29 = vpop.f32.mrb[15].mxu0  ;;  %v6668_v61 = vld [vmem:[#allocation8 + $0x3c0] ss:$12 sps:$4 sm:$0xff]   ;;  %v6673_v53 = vld [vmem:[#allocation8 + $0x3d8] ss:$12 sps:$4 sm:$0xff]  }
 0x20a   :  { %5795 = vmatpush3.bf16.msra.mxu1 %v6651_v55  ;;  %v2565_v11 = vmax.f32 %v5965_v2, 0.0  ;;  %v5967_v31 = vadd.f32 %v2423_v29, %v435_v50  ;;  %v6676_v50 = vld [vmem:[#allocation8 + $0x308] ss:$12 sps:$4 sm:$0xff]   ;;  %v6681_v55 = vld [vmem:[#allocation8 + $0x320] ss:$12 sps:$4 sm:$0xff]  }
 0x20b   :  { %5796 = vmatprep.subr.bf16.mxu1 %v6652_v56  ;;  %v2576_v36 = vmax.f32 %v5966_v28, 0.0  ;;  %v6685_v56 = vld [vmem:[#allocation8 + $0x40c] ss:$12 sps:$4 sm:$0xff]   ;;  %v6710_v21 = vld [vmem:[#allocation8 + $0x484] ss:$12 sps:$4 sm:$0xff]  }
 0x20c   :  { %4656 = vmatpush1.bf16.msra.mxu0 %v6648_v59  ;;  %v2577_v39 = vmax.f32 %v5967_v31, 0.0  ;;  %v6683_v59 = vld [vmem:[#allocation8 + $0x408] ss:$12 sps:$4 sm:$0xff]   ;;  %v6708_v63 = vld [vmem:[#allocation8 + $0x480] ss:$12 sps:$4 sm:$0xff]  }
 0x20d   :  { %4657 = vmatprep.subr.bf16.mxu0 %v6655_v7  ;;  %v7279_v42 = vpack.c.bf16 %v2576_v36, %v2564_v27  ;;  %v6696_v7 = vld [vmem:[#allocation8 + $0x368] ss:$12 sps:$4 sm:$0xff]   ;;  %v6717_v25 = vld [vmem:[#allocation8 + $0x560] ss:$12 sps:$4 sm:$0xff]   ;;  %v6722_v29 = vld [vmem:[#allocation8 + $0x578] ss:$12 sps:$4 sm:$0xff]  }
 0x20e   :  { %5797 = vmatpush3.bf16.msra.mxu1 %v6656_v10  ;;  %v7281_v47 = vpack.c.bf16 %v2577_v39, %v2565_v11  ;;  %v6701_v10 = vld [vmem:[#allocation8 + $0x380] ss:$12 sps:$4 sm:$0xff]   ;;  %v6712_v23 = vld [vmem:[#allocation8 + $0x548] ss:$12 sps:$4 sm:$0xff]   ;;  %v6726_v31 = vld [vmem:[#allocation8 + $0x4b8] ss:$12 sps:$4 sm:$0xff]  }
 0x20f   :  { %5798 = vmatprep.subr.bf16.mxu1 %v6657_v14  ;;  %v6705_v14 = vld [vmem:[#allocation8 + $0x46c] ss:$12 sps:$4 sm:$0xff]   ;;  %v6716_v2 = vld [vmem:[#allocation8 + $0x488] ss:$12 sps:$4 sm:$0xff]   ;;  %v6731_v36 = vld [vmem:[#allocation8 + $0x4d0] ss:$12 sps:$4 sm:$0xff]  }
 0x210   :  { %4658 = vmatpush1.bf16.msra.mxu0 %v6653_v20  ;;  %v6707_v20 = vld [vmem:[#allocation8 + $0x470] ss:$12 sps:$4 sm:$0xff]   ;;  %v6720_v27 = vld [vmem:[#allocation8 + $0x4b4] ss:$12 sps:$4 sm:$0xff]   ;;  %v6725_v11 = vld [vmem:[#allocation8 + $0x4cc] ss:$12 sps:$4 sm:$0xff]  }
 0x211   :  { %4659 = vmatprep.subr.bf16.mxu0 %v6660_v8  ;;  %v6703_v8 = vld [vmem:[#allocation8 + $0x468] ss:$12 sps:$4 sm:$0xff]   ;;  %v6721_v28 = vld [vmem:[#allocation8 + $0x4a0] ss:$12 sps:$4 sm:$0xff]  }
 0x212   :  { %5799 = vmatpush3.bf16.msra.mxu1 %v6661_v22  ;;  %v6711_v22 = vld [vmem:[#allocation8 + $0x3b0] ss:$12 sps:$4 sm:$0xff]   ;;  %v6728_v39 = vld [vmem:[#allocation8 + $0x4e0] ss:$12 sps:$4 sm:$0xff]  }
 0x213   :  { %5800 = vmatprep.subr.bf16.mxu1 %v6662_v24  ;;  %v6715_v24 = vld [vmem:[#allocation8 + $0x49c] ss:$12 sps:$4 sm:$0xff]  }
 0x214   :  { %4660 = vmatpush1.bf16.msra.mxu0 %v6658_v26  ;;  %v6713_v26 = vld [vmem:[#allocation8 + $0x498] ss:$12 sps:$4 sm:$0xff]  }
 0x215   :  { %4661 = vmatprep.subr.bf16.mxu0 %v6665_v30  ;;  %v6718_v30 = vld [vmem:[#allocation8 + $0x4b0] ss:$12 sps:$4 sm:$0xff]  }
 0x216   :  { %5801 = vmatpush3.bf16.msra.mxu1 %v6666_v32  ;;  %v6727_v32 = vld [vmem:[#allocation8 + $0x590] ss:$12 sps:$4 sm:$0xff]  }
 0x217   :  { %5802 = vmatprep.subr.bf16.mxu1 %v6667_v37  ;;  %v6732_v37 = vld [vmem:[#allocation8 + $0x5a8] ss:$12 sps:$4 sm:$0xff]  }
 0x218   :  { %4662 = vmatpush1.bf16.msra.mxu0 %v6663_v41  ;;  %v6735_v41 = vld [vmem:[#allocation8 + $0x4fc] ss:$12 sps:$4 sm:$0xff]  }
 0x219   :  { %4663 = vmatprep.subr.bf16.mxu0 %v6670_v44  ;;  %v422_v44 = vsub.s32 6, %v7200_v6 }
 0x21a   :  { %5803 = vmatpush3.bf16.msra.mxu1 %v6671_v34  ;;  %v6736_v34 = vld [vmem:[#allocation8 + $0x4e8] ss:$12 sps:$4 sm:$0xff]  }
 0x21b   :  { %5816 = vmatprep.subr.bf16.mxu1 %v6672_v48  ;;  %v426_v48 = vsub.s32 7, %v7200_v6  ;;  %v6855_v6 = vld [vmem:[#allocation8 + $0x784] ss:$12 sps:$4 sm:$0xff]  }
 0x21c   :  { %4664 = vmatpush1.bf16.msra.mxu0 %v6668_v61  ;;  %v6737_v61 = vld [vmem:[#allocation8 + $0x5c0] ss:$12 sps:$4 sm:$0xff]  }
 0x21d   :  { %4941 = vmatmul.mubr.bf16.vlgmr.msra.gmra.mrb[40].mxu1 %v7256_v17  ;;  %4665 = vmatprep.subr.bf16.mxu0 %v6675_v49  ;;  %v6690_v17 = vld [vmem:[#allocation8 + $0x424] ss:$12 sps:$4 sm:$0xff]   ;;  %v6901_v49 = vld [vmem:[#allocation7] sm:$0xff] }
 0x21e   :  { %4948 = vmatprep.mubr.bf16.mxu1 %v7265_v46  ;;  %5817 = vmatpush3.bf16.msra.mxu1 %v6676_v50  ;;  %v6691_v46 = vld [vmem:[#allocation8 + $0x350] ss:$12 sps:$4 sm:$0xff]   ;;  %v423_v50 = vrot.slane %v6901_v49, %v422_v44 }
 0x21f   :  { %5818 = vmatprep.subr.bf16.mxu1 %v6677_v52  ;;  %v6740_v52 = vld [vmem:[#allocation8 + $0x514] ss:$12 sps:$4 sm:$0xff]  }
 0x220   :  { %4666 = vmatpush1.bf16.msra.mxu0 %v6673_v53  ;;  %v427_v53 = vrot.slane %v6901_v49, %v426_v48  ;;  %v6765_v48 = vld [vmem:[#allocation8 + $0x58c] ss:$12 sps:$4 sm:$0xff]   ;;  %v6763_v49 = vld [vmem:[#allocation8 + $0x588] ss:$12 sps:$4 sm:$0xff]  }
 0x221   :  { %4667 = vmatprep.subr.bf16.mxu0 %v6680_v54  ;;  %v6741_v54 = vld [vmem:[#allocation8 + $0x500] ss:$12 sps:$4 sm:$0xff]  }
 0x222   :  { %5819 = vmatpush3.bf16.msra.mxu1 %v6681_v55  ;;  %v6742_v55 = vld [vmem:[#allocation8 + $0x5d8] ss:$12 sps:$4 sm:$0xff]  }
 0x223   :  { %5820 = vmatprep.subr.bf16.mxu1 %v6682_v51 }
 0x224   :  { %4668 = vmatpush1.bf16.msra.mxu0 %v6678_v35  ;;  %v6738_v35 = vld [vmem:[#allocation8 + $0x510] ss:$12 sps:$4 sm:$0xff]  }
 0x225   :  { %4949 = vmatmul.mubr.bf16.gmra.mrb[44].mxu1 %v7261_v43  ;;  %4669 = vmatprep.subr.bf16.mxu0 %v6685_v56  ;;  %v6700_v43 = vld [vmem:[#allocation8 + $0x454] ss:$12 sps:$4 sm:$0xff]  }
 0x226   :  { %5821 = vmatpush3.bf16.msra.mxu1 %v6686_v57  ;;  %4989 = vmatprep.mubr.bf16.mxu1 %v7233_v38  ;;  %v6698_v38 = vld [vmem:[#allocation8 + $0x450] ss:$12 sps:$4 sm:$0xff]  }
 0x227   :  { %5822 = vmatprep.subr.bf16.mxu1 %v6687_v58  ;;  %v6745_v58 = vld [vmem:[#allocation8 + $0x52c] ss:$12 sps:$4 sm:$0xff]  }
 0x228   :  { %4670 = vmatpush1.bf16.msra.mxu0 %v6683_v59 }
 0x229   :  { %4671 = vmatprep.subr.bf16.mxu0 %v6690_v17 }
 0x22a   :  { %5823 = vmatpush3.bf16.msra.mxu1 %v6691_v46  ;;  %v6746_v46 = vld [vmem:[#allocation8 + $0x518] ss:$12 sps:$4 sm:$0xff]  }
 0x22b   :  { %5824 = vmatprep.subr.bf16.mxu1 %v6692_v0 }
 0x22c   :  { %4672 = vmatpush1.bf16.msra.mxu0 %v6688_v1 }
 0x22d   :  { %4673 = vmatprep.subr.bf16.mxu0 %v6695_v4 }
 0x22e   :  { %5825 = vmatpush3.bf16.msra.mxu1 %v6696_v7  ;;  %v6747_v7 = vld [vmem:[#allocation8 + $0x5f0] ss:$12 sps:$4 sm:$0xff]  }
 0x22f   :  { %5826 = vmatprep.subr.bf16.mxu1 %v6697_v60 }
 0x230   :  { %4674 = vmatpush1.bf16.msra.mxu0 %v6693_v5  ;;  %v6743_v5 = vld [vmem:[#allocation8 + $0x528] ss:$12 sps:$4 sm:$0xff]  }
 0x231   :  { %4675 = vmatprep.subr.bf16.mxu0 %v6700_v43 }
 0x232   :  { %5827 = vmatpush3.bf16.msra.mxu1 %v6701_v10  ;;  %v6750_v10 = vld [vmem:[#allocation8 + $0x544] ss:$12 sps:$4 sm:$0xff]  }
 0x233   :  { %5828 = vmatprep.subr.bf16.mxu1 %v6702_v13 }
 0x234   :  { %4676 = vmatpush1.bf16.msra.mxu0 %v6698_v38 }
 0x235   :  { %4677 = vmatprep.subr.bf16.mxu0 %v6705_v14  ;;  %v6751_v14 = vld [vmem:[#allocation8 + $0x530] ss:$12 sps:$4 sm:$0xff]  }
 0x236   :  { %5829 = vmatpush3.bf16.msra.mxu1 %v6706_v15 }
 0x237   :  { %5830 = vmatprep.subr.bf16.mxu1 %v6707_v20  ;;  %v6752_v20 = vld [vmem:[#allocation8 + $0x6c8] ss:$12 sps:$4 sm:$0xff]  }
 0x238   :  { %4678 = vmatpush1.bf16.msra.mxu0 %v6703_v8 }
 0x239   :  { %4700 = vmatprep.subr.bf16.mxu0 %v6710_v21 }
 0x23a   :  { %5831 = vmatpush3.bf16.msra.mxu1 %v6711_v22  ;;  %v6748_v22 = vld [vmem:[#allocation8 + $0x540] ss:$12 sps:$4 sm:$0xff]  }
 0x23b   :  { %4680 = vmatmul.mubr.bf16.vlgmr.msra.gmra.mrb[16].mxu0 %v7231_v33  ;;  %5844 = vmatprep.subr.bf16.mxu1 %v6712_v23 }
 0x23c   :  { %4689 = vmatprep.mubr.bf16.mxu0 %v7237_v3  ;;  %4701 = vmatpush1.bf16.msra.mxu0 %v6708_v63 }
 0x23d   :  { %4990 = vmatmul.mubr.bf16.vlgmr.msra.gmra.mrb[48].mxu1 %v7231_v33  ;;  %4702 = vmatprep.subr.bf16.mxu0 %v6715_v24  ;;  %v6723_v33 = vld [vmem:[#allocation8 + $0x4c8] ss:$12 sps:$4 sm:$0xff]  }
 0x23e   :  { %4997 = vmatprep.mubr.bf16.mxu1 %v7237_v3  ;;  %5845 = vmatpush3.bf16.msra.mxu1 %v6716_v2  ;;  %v6730_v3 = vld [vmem:[#allocation8 + $0x4e4] ss:$12 sps:$4 sm:$0xff]   ;;  %v6755_v24 = vld [vmem:[#allocation8 + $0x55c] ss:$12 sps:$4 sm:$0xff]  }
 0x23f   :  { %5846 = vmatprep.subr.bf16.mxu1 %v6717_v25 }
 0x240   :  { %4703 = vmatpush1.bf16.msra.mxu0 %v6713_v26  ;;  %v6756_v26 = vld [vmem:[#allocation8 + $0x608] ss:$12 sps:$4 sm:$0xff]  }
 0x241   :  { %4704 = vmatprep.subr.bf16.mxu0 %v6720_v27 }
 0x242   :  { %5847 = vmatpush3.bf16.msra.mxu1 %v6721_v28 }
 0x243   :  { %4690 = vmatmul.mubr.bf16.gmra.mrb[20].mxu0 %v7235_v62  ;;  %5848 = vmatprep.subr.bf16.mxu1 %v6722_v29 }
 0x244   :  { %4705 = vmatpush1.bf16.msra.mxu0 %v6718_v30  ;;  %v6757_v30 = vld [vmem:[#allocation8 + $0x6e0] ss:$12 sps:$4 sm:$0xff]  }
 0x245   :  { %4998 = vmatmul.mubr.bf16.gmra.mrb[52].mxu1 %v7235_v62  ;;  %4706 = vmatprep.subr.bf16.mxu0 %v6725_v11  ;;  %v6733_v62 = vld [vmem:[#allocation8 + $0x4f8] ss:$12 sps:$4 sm:$0xff]  }
 0x246   :  { %5849 = vmatpush3.bf16.msra.mxu1 %v6726_v31 }
 0x247   :  { %5850 = vmatprep.subr.bf16.mxu1 %v6727_v32  ;;  %v6753_v32 = vld [vmem:[#allocation8 + $0x558] ss:$12 sps:$4 sm:$0xff]  }
 0x248   :  { %4707 = vmatpush1.bf16.msra.mxu0 %v6723_v33 }
 0x249   :  { %4708 = vmatprep.subr.bf16.mxu0 %v6730_v3  ;;  %v6760_v3 = vld [vmem:[#allocation8 + $0x574] ss:$12 sps:$4 sm:$0xff]  }
 0x24a   :  { %5851 = vmatpush3.bf16.msra.mxu1 %v6731_v36 }
 0x24b   :  { %5852 = vmatprep.subr.bf16.mxu1 %v6732_v37  ;;  %v6761_v37 = vld [vmem:[#allocation8 + $0x620] ss:$12 sps:$4 sm:$0xff]  }
 0x24c   :  { %4709 = vmatpush1.bf16.msra.mxu0 %v6728_v39 }
 0x24d   :  { %4710 = vmatprep.subr.bf16.mxu0 %v6735_v41  ;;  %v6762_v41 = vld [vmem:[#allocation8 + $0x6f8] ss:$12 sps:$4 sm:$0xff]  }
 0x24e   :  { %5853 = vmatpush3.bf16.msra.mxu1 %v6736_v34  ;;  %v6758_v34 = vld [vmem:[#allocation8 + $0x570] ss:$12 sps:$4 sm:$0xff]  }
 0x24f   :  { %5854 = vmatprep.subr.bf16.mxu1 %v6737_v61  ;;  %v6766_v61 = vld [vmem:[#allocation8 + $0x638] ss:$12 sps:$4 sm:$0xff]  }
 0x250   :  { %4711 = vmatpush1.bf16.msra.mxu0 %v6733_v62  ;;  %v2301_v51 = vpop.f32.mrb[16].mxu1  ;;  %v6767_v62 = vld [vmem:[#allocation8 + $0x710] ss:$12 sps:$4 sm:$0xff]  }
 0x251   :  { %v5952_v56 = vadd.f32 %v2301_v51, %v423_v50  ;;  %v2303_v57 = vpop.f32.mrb[17].mxu1  ;;  %4712 = vmatprep.subr.bf16.mxu0 %v6740_v52  ;;  %v6771_v52 = vld [vmem:[#allocation8 + $0x650] ss:$12 sps:$4 sm:$0xff]   ;;  %v6776_v51 = vld [vmem:[#allocation8 + $0x668] ss:$12 sps:$4 sm:$0xff]  }
 0x252   :  { %v5953_v59 = vadd.f32 %v2303_v57, %v427_v53  ;;  %v2305_v17 = vpop.f32.mrb[18].mxu1  ;;  %5855 = vmatpush3.bf16.msra.mxu1 %v6741_v54  ;;  %v6768_v54 = vld [vmem:[#allocation8 + $0x5a0] ss:$12 sps:$4 sm:$0xff]  }
 0x253   :  { %v2538_v0 = vmax.f32 %v5952_v56, 0.0  ;;  %v5954_v1 = vadd.f32 %v2305_v17, %v423_v50  ;;  %v2307_v4 = vpop.f32.mrb[19].mxu1  ;;  %5856 = vmatprep.subr.bf16.mxu1 %v6742_v55  ;;  %v6775_v55 = vld [vmem:[#allocation8 + $0x5bc] ss:$12 sps:$4 sm:$0xff]   ;;  %v6773_v56 = vld [vmem:[#allocation8 + $0x5b8] ss:$12 sps:$4 sm:$0xff]  }
 0x254   :  { %v5955_v60 = vadd.f32 %v2307_v4, %v427_v53  ;;  %4713 = vmatpush1.bf16.msra.mxu0 %v6738_v35  ;;  %v2539_v13 = vmax.f32 %v5953_v59, 0.0  ;;  %v6777_v35 = vld [vmem:[#allocation8 + $0x740] ss:$12 sps:$4 sm:$0xff]   ;;  %v6782_v59 = vld [vmem:[#allocation8 + $0x758] ss:$12 sps:$4 sm:$0xff]  }
 0x255   :  { %v2550_v43 = vmax.f32 %v5954_v1, 0.0  ;;  %4714 = vmatprep.subr.bf16.mxu0 %v6745_v58  ;;  %v6780_v57 = vld [vmem:[#allocation8 + $0x5d4] ss:$12 sps:$4 sm:$0xff]   ;;  %v6778_v17 = vld [vmem:[#allocation8 + $0x5d0] ss:$12 sps:$4 sm:$0xff]  }
 0x256   :  { %v2551_v38 = vmax.f32 %v5955_v60, 0.0  ;;  %5857 = vmatpush3.bf16.msra.mxu1 %v6746_v46  ;;  %v6781_v58 = vld [vmem:[#allocation8 + $0x680] ss:$12 sps:$4 sm:$0xff]   ;;  %v6787_v1 = vld [vmem:[#allocation8 + $0x770] ss:$12 sps:$4 sm:$0xff]  }
 0x257   :  { %v7295_v15 = vpack.c.bf16 %v2550_v43, %v2538_v0  ;;  %5858 = vmatprep.subr.bf16.mxu1 %v6747_v7  ;;  %v6785_v46 = vld [vmem:[#allocation8 + $0x5ec] ss:$12 sps:$4 sm:$0xff]   ;;  %v6783_v4 = vld [vmem:[#allocation8 + $0x5e8] ss:$12 sps:$4 sm:$0xff]   ;;  %v6790_v7 = vld [vmem:[#allocation8 + $0x604] ss:$12 sps:$4 sm:$0xff]  }
 0x258   :  { %v2587_v8 = vpack.c.bf16 %v2551_v38, %v2539_v13  ;;  %4715 = vmatpush1.bf16.msra.mxu0 %v6743_v5  ;;  %v2311_v21 = vpop.f32.mrb[20].mxu1  ;;  %v6786_v0 = vld [vmem:[#allocation8 + $0x698] ss:$12 sps:$4 sm:$0xff]   ;;  %v6791_v60 = vld [vmem:[#allocation8 + $0x6b0] ss:$12 sps:$4 sm:$0xff]  }
 0x259   :  { %v5956_v23 = vadd.f32 %v2311_v21, %v423_v50  ;;  %4716 = vmatprep.subr.bf16.mxu0 %v6750_v10  ;;  %v2313_v63 = vpop.f32.mrb[21].mxu1  ;;  %v6816_v5 = vld [vmem:[#allocation8 + $0x848] ss:$12 sps:$4 sm:$0xff]   ;;  %v6788_v43 = vld [vmem:[#allocation8 + $0x600] ss:$12 sps:$4 sm:$0xff]  }
 0x25a   :  { %4732 = vmatprep.mubr.bf16.mxu0 %v2587_v8  ;;  %5859 = vmatpush3.bf16.msra.mxu1 %v6751_v14  ;;  %v5957_v2 = vadd.f32 %v2313_v63, %v427_v53  ;;  %v2315_v25 = vpop.f32.mrb[22].mxu1  ;;  %v6794_v10 = vld [vmem:[#allocation8 + $0x61c] ss:$12 sps:$4 sm:$0xff]   ;;  %v6821_v38 = vld [vmem:[#allocation8 + $0x860] ss:$12 sps:$4 sm:$0xff]  }
 0x25b   :  { %v2562_v27 = vmax.f32 %v5956_v23, 0.0  ;;  %5038 = vmatprep.mubr.bf16.mxu1 %v2587_v8  ;;  %v5958_v28 = vadd.f32 %v2315_v25, %v423_v50  ;;  %v2317_v29 = vpop.f32.mrb[23].mxu1  ;;  %5872 = vmatprep.subr.bf16.mxu1 %v6752_v20  ;;  %v6770_v50 = vld [vmem:[#allocation8 + $0x5a4] ss:$12 sps:$4 sm:$0xff]   ;;  %v6817_v13 = vld [vmem:[#allocation8 + $0x788] ss:$12 sps:$4 sm:$0xff]  }
 0x25c   :  { %v2563_v11 = vmax.f32 %v5957_v2, 0.0  ;;  %4717 = vmatpush1.bf16.msra.mxu0 %v6748_v22  ;;  %v5959_v31 = vadd.f32 %v2317_v29, %v427_v53  ;;  %v6772_v53 = vld [vmem:[#allocation8 + $0x728] ss:$12 sps:$4 sm:$0xff]   ;;  %v6792_v14 = vld [vmem:[#allocation8 + $0x618] ss:$12 sps:$4 sm:$0xff]  }
 0x25d   :  { %v2574_v33 = vmax.f32 %v5958_v28, 0.0  ;;  %5039 = vmatmul.mubr.bf16.vlgmr.msra.gmra.mrb[56].mxu1 %v7295_v15  ;;  %4718 = vmatprep.subr.bf16.mxu0 %v6755_v24  ;;  %v6797_v20 = vld [vmem:[#allocation8 + $0x634] ss:$12 sps:$4 sm:$0xff]   ;;  %v6826_v21 = vld [vmem:[#allocation8 + $0x878] ss:$12 sps:$4 sm:$0xff]  }
 0x25e   :  { %v2575_v36 = vmax.f32 %v5959_v31, 0.0  ;;  %5873 = vmatpush3.bf16.msra.mxu1 %v6756_v26  ;;  %v6822_v8 = vld [vmem:[#allocation8 + $0x7a0] ss:$12 sps:$4 sm:$0xff]   ;;  %v6795_v22 = vld [vmem:[#allocation8 + $0x630] ss:$12 sps:$4 sm:$0xff]  }
 0x25f   :  { %v7298_v39 = vpack.c.bf16 %v2574_v33, %v2562_v27  ;;  %5874 = vmatprep.subr.bf16.mxu1 %v6757_v30  ;;  %v6800_v23 = vld [vmem:[#allocation8 + $0x64c] ss:$12 sps:$4 sm:$0xff]   ;;  %v6831_v63 = vld [vmem:[#allocation8 + $0x890] ss:$12 sps:$4 sm:$0xff]   ;;  %v6798_v24 = vld [vmem:[#allocation8 + $0x648] ss:$12 sps:$4 sm:$0xff]  }
 0x260   :  { %v2599_v44 = vpack.c.bf16 %v2575_v36, %v2563_v11  ;;  %4719 = vmatpush1.bf16.msra.mxu0 %v6753_v32  ;;  %v6803_v2 = vld [vmem:[#allocation8 + $0x664] ss:$12 sps:$4 sm:$0xff]   ;;  %v6836_v26 = vld [vmem:[#allocation8 + $0x8a8] ss:$12 sps:$4 sm:$0xff]   ;;  %v6801_v27 = vld [vmem:[#allocation8 + $0x660] ss:$12 sps:$4 sm:$0xff]  }
 0x261   :  { %4720 = vmatprep.subr.bf16.mxu0 %v6760_v3  ;;  %v6832_v25 = vld [vmem:[#allocation8 + $0x7d0] ss:$12 sps:$4 sm:$0xff]   ;;  %v6837_v29 = vld [vmem:[#allocation8 + $0x7e8] ss:$12 sps:$4 sm:$0xff]   ;;  %v6841_v30 = vld [vmem:[#allocation8 + $0x8c0] ss:$12 sps:$4 sm:$0xff]  }
 0x262   :  { %5875 = vmatpush3.bf16.msra.mxu1 %v6761_v37  ;;  %5046 = vmatprep.mubr.bf16.mxu1 %v2599_v44  ;;  %v6806_v28 = vld [vmem:[#allocation8 + $0x67c] ss:$12 sps:$4 sm:$0xff]   ;;  %v6804_v11 = vld [vmem:[#allocation8 + $0x678] ss:$12 sps:$4 sm:$0xff]   ;;  %v6842_v31 = vld [vmem:[#allocation8 + $0x800] ss:$12 sps:$4 sm:$0xff]  }
 0x263   :  { %5876 = vmatprep.subr.bf16.mxu1 %v6762_v41  ;;  %v6846_v32 = vld [vmem:[#allocation8 + $0x8d8] ss:$12 sps:$4 sm:$0xff]   ;;  %v6807_v33 = vld [vmem:[#allocation8 + $0x690] ss:$12 sps:$4 sm:$0xff]  }
 0x264   :  { %4721 = vmatpush1.bf16.msra.mxu0 %v6758_v34  ;;  %v6812_v3 = vld [vmem:[#allocation8 + $0x6ac] ss:$12 sps:$4 sm:$0xff]   ;;  %v6851_v37 = vld [vmem:[#allocation8 + $0x8f0] ss:$12 sps:$4 sm:$0xff]  }
 0x265   :  { %5047 = vmatmul.mubr.bf16.gmra.mrb[60].mxu1 %v7298_v39  ;;  %4722 = vmatprep.subr.bf16.mxu0 %v6765_v48  ;;  %v6847_v36 = vld [vmem:[#allocation8 + $0x818] ss:$12 sps:$4 sm:$0xff]   ;;  %v6813_v34 = vld [vmem:[#allocation8 + $0x6c0] ss:$12 sps:$4 sm:$0xff]   ;;  %v6820_v48 = vld [vmem:[#allocation8 + $0x6dc] ss:$12 sps:$4 sm:$0xff]  }
 0x266   :  { %5877 = vmatpush3.bf16.msra.mxu1 %v6766_v61  ;;  %5087 = vmatprep.mubr.bf16.mxu1 %v7277_v19  ;;  %v6815_v41 = vld [vmem:[#allocation8 + $0x6c4] ss:$12 sps:$4 sm:$0xff]  }
 0x267   :  { %5878 = vmatprep.subr.bf16.mxu1 %v6767_v62  ;;  %v6818_v61 = vld [vmem:[#allocation8 + $0x6d8] ss:$12 sps:$4 sm:$0xff]   ;;  %v6825_v62 = vld [vmem:[#allocation8 + $0x6f4] ss:$12 sps:$4 sm:$0xff]  }
 0x268   :  { %4723 = vmatpush1.bf16.msra.mxu0 %v6763_v49  ;;  %v6823_v49 = vld [vmem:[#allocation8 + $0x6f0] ss:$12 sps:$4 sm:$0xff]  }
 0x269   :  { %4724 = vmatprep.subr.bf16.mxu0 %v6770_v50  ;;  %v6830_v50 = vld [vmem:[#allocation8 + $0x70c] ss:$12 sps:$4 sm:$0xff]  }
 0x26a   :  { %5879 = vmatpush3.bf16.msra.mxu1 %v6771_v52  ;;  %v6828_v52 = vld [vmem:[#allocation8 + $0x708] ss:$12 sps:$4 sm:$0xff]  }
 0x26b   :  { %5880 = vmatprep.subr.bf16.mxu1 %v6772_v53  ;;  %v6835_v53 = vld [vmem:[#allocation8 + $0x724] ss:$12 sps:$4 sm:$0xff]  }
 0x26c   :  { %4725 = vmatpush1.bf16.msra.mxu0 %v6768_v54  ;;  %v6833_v54 = vld [vmem:[#allocation8 + $0x720] ss:$12 sps:$4 sm:$0xff]  }
 0x26d   :  { %4726 = vmatprep.subr.bf16.mxu0 %v6775_v55  ;;  %v6840_v55 = vld [vmem:[#allocation8 + $0x73c] ss:$12 sps:$4 sm:$0xff]  }
 0x26e   :  { %5881 = vmatpush3.bf16.msra.mxu1 %v6776_v51  ;;  %v6838_v51 = vld [vmem:[#allocation8 + $0x738] ss:$12 sps:$4 sm:$0xff]  }
 0x26f   :  { %5882 = vmatprep.subr.bf16.mxu1 %v6777_v35  ;;  %v439_v35 = vrot.slane %v7263_v45, %v7248_v40 }
 0x270   :  { %4727 = vmatpush1.bf16.msra.mxu0 %v6773_v56  ;;  %v6845_v56 = vld [vmem:[#allocation8 + $0x754] ss:$12 sps:$4 sm:$0xff]  }
 0x271   :  { %4728 = vmatprep.subr.bf16.mxu0 %v6780_v57  ;;  %v443_v57 = vrot.slane %v7263_v45, %v410_v18 }
 0x272   :  { %5883 = vmatpush3.bf16.msra.mxu1 %v6781_v58 }
 0x273   :  { %5884 = vmatprep.subr.bf16.mxu1 %v6782_v59  ;;  %v6843_v59 = vld [vmem:[#allocation8 + $0x750] ss:$12 sps:$4 sm:$0xff]  }
 0x274   :  { %4729 = vmatpush1.bf16.msra.mxu0 %v6778_v17 }
 0x275   :  { %4730 = vmatprep.subr.bf16.mxu0 %v6785_v46 }
 0x276   :  { %5885 = vmatpush3.bf16.msra.mxu1 %v6786_v0  ;;  %v6850_v0 = vld [vmem:[#allocation8 + $0x76c] ss:$12 sps:$4 sm:$0xff]  }
 0x277   :  { %5886 = vmatprep.subr.bf16.mxu1 %v6787_v1 }
 0x278   :  { %4731 = vmatpush1.bf16.msra.mxu0 %v6783_v4 }
 0x279   :  { %4753 = vmatprep.subr.bf16.mxu0 %v6790_v7 }
 0x27a   :  { %5887 = vmatpush3.bf16.msra.mxu1 %v6791_v60 }
 0x27b   :  { %4733 = vmatmul.mubr.bf16.vlgmr.msra.gmra.mrb[16].mxu0 %v7295_v15  ;;  %5900 = vmatprep.subr.bf16.mxu1 %v6816_v5  ;;  %v6827_v15 = vld [vmem:[#allocation8 + $0x7b8] ss:$12 sps:$4 sm:$0xff]  }
 0x27c   :  { %4742 = vmatprep.mubr.bf16.mxu0 %v2599_v44  ;;  %4754 = vmatpush1.bf16.msra.mxu0 %v6788_v43  ;;  %v6852_v44 = vld [vmem:[#allocation8 + $0x830] ss:$12 sps:$4 sm:$0xff]  }
 0x27d   :  { %5088 = vmatmul.mubr.bf16.vlgmr.msra.gmra.mrb[64].mxu1 %v7275_v16  ;;  %4755 = vmatprep.subr.bf16.mxu0 %v6794_v10 }
 0x27e   :  { %5095 = vmatprep.mubr.bf16.mxu1 %v7281_v47  ;;  %5901 = vmatpush3.bf16.msra.mxu1 %v6817_v13  ;;  %v6848_v13 = vld [vmem:[#allocation8 + $0x768] ss:$12 sps:$4 sm:$0xff]  }
 0x27f   :  { %5902 = vmatprep.subr.bf16.mxu1 %v6821_v38 }
 0x280   :  { %4756 = vmatpush1.bf16.msra.mxu0 %v6792_v14 }
 0x281   :  { %4757 = vmatprep.subr.bf16.mxu0 %v6797_v20 }
 0x282   :  { %5903 = vmatpush3.bf16.msra.mxu1 %v6822_v8  ;;  %v6853_v8 = vld [vmem:[#allocation8 + $0x780] ss:$12 sps:$4 sm:$0xff]  }
 0x283   :  { %4743 = vmatmul.mubr.bf16.gmra.mrb[20].mxu0 %v7298_v39  ;;  %5904 = vmatprep.subr.bf16.mxu1 %v6826_v21  ;;  %v6810_v39 = vld [vmem:[#allocation8 + $0x6a8] ss:$12 sps:$4 sm:$0xff]  }
 0x284   :  { %4758 = vmatpush1.bf16.msra.mxu0 %v6795_v22  ;;  %4785 = vmatprep.mubr.bf16.mxu0 %v7277_v19  ;;  %v6809_v19 = vld [vmem:[#allocation8 + $0x694] ss:$12 sps:$4 sm:$0xff]  }
 0x285   :  { %5096 = vmatmul.mubr.bf16.gmra.mrb[68].mxu1 %v7279_v42  ;;  %4759 = vmatprep.subr.bf16.mxu0 %v6800_v23  ;;  %v6858_v23 = vld [vmem:[#allocation8 + $0x79c] ss:$12 sps:$4 sm:$0xff]  }
 0x286   :  { %5905 = vmatpush3.bf16.msra.mxu1 %v6827_v15 }
 0x287   :  { %5906 = vmatprep.subr.bf16.mxu1 %v6831_v63 }
 0x288   :  { %4760 = vmatpush1.bf16.msra.mxu0 %v6798_v24 }
 0x289   :  { %4761 = vmatprep.subr.bf16.mxu0 %v6803_v2 }
 0x28a   :  { %5907 = vmatpush3.bf16.msra.mxu1 %v6832_v25 }
 0x28b   :  { %5908 = vmatprep.subr.bf16.mxu1 %v6836_v26 }
 0x28c   :  { %4762 = vmatpush1.bf16.msra.mxu0 %v6801_v27 }
 0x28d   :  { %4763 = vmatprep.subr.bf16.mxu0 %v6806_v28  ;;  %v6856_v28 = vld [vmem:[#allocation8 + $0x798] ss:$12 sps:$4 sm:$0xff]  }
 0x28e   :  { %5909 = vmatpush3.bf16.msra.mxu1 %v6837_v29 }
 0x28f   :  { %5910 = vmatprep.subr.bf16.mxu1 %v6841_v30  ;;  %v6861_v30 = vld [vmem:[#allocation8 + $0x7b4] ss:$12 sps:$4 sm:$0xff]  }
 0x290   :  { %4764 = vmatpush1.bf16.msra.mxu0 %v6804_v11 }
 0x291   :  { %4765 = vmatprep.subr.bf16.mxu0 %v6809_v19 }
 0x292   :  { %5911 = vmatpush3.bf16.msra.mxu1 %v6842_v31 }
 0x293   :  { %5912 = vmatprep.subr.bf16.mxu1 %v6846_v32  ;;  %v6859_v32 = vld [vmem:[#allocation8 + $0x7b0] ss:$12 sps:$4 sm:$0xff]  }
 0x294   :  { %4766 = vmatpush1.bf16.msra.mxu0 %v6807_v33  ;;  %v6867_v33 = vld [vmem:[#allocation8 + $0x7e4] ss:$12 sps:$4 sm:$0xff]  }
 0x295   :  { %4767 = vmatprep.subr.bf16.mxu0 %v6812_v3  ;;  %v6865_v3 = vld [vmem:[#allocation8 + $0x7e0] ss:$12 sps:$4 sm:$0xff]  }
 0x296   :  { %5913 = vmatpush3.bf16.msra.mxu1 %v6847_v36  ;;  %v6870_v36 = vld [vmem:[#allocation8 + $0x7fc] ss:$12 sps:$4 sm:$0xff]  }
 0x297   :  { %5914 = vmatprep.subr.bf16.mxu1 %v6851_v37  ;;  %v6868_v37 = vld [vmem:[#allocation8 + $0x7f8] ss:$12 sps:$4 sm:$0xff]  }
 0x298   :  { %4768 = vmatpush1.bf16.msra.mxu0 %v6810_v39  ;;  %v6873_v39 = vld [vmem:[#allocation8 + $0x814] ss:$12 sps:$4 sm:$0xff]  }
 0x299   :  { %4769 = vmatprep.subr.bf16.mxu0 %v6815_v41 }
 0x29a   :  { %5915 = vmatpush3.bf16.msra.mxu1 %v6852_v44  ;;  %v6871_v44 = vld [vmem:[#allocation8 + $0x810] ss:$12 sps:$4 sm:$0xff]  }
 0x29c   :  { %4770 = vmatpush1.bf16.msra.mxu0 %v6813_v34 }
 0x29d   :  { %4771 = vmatprep.subr.bf16.mxu0 %v6820_v48 }
 0x2a0   :  { %4772 = vmatpush1.bf16.msra.mxu0 %v6818_v61 }
 0x2a1   :  { %4773 = vmatprep.subr.bf16.mxu0 %v6825_v62 }
 0x2a4   :  { %4774 = vmatpush1.bf16.msra.mxu0 %v6823_v49 }
 0x2a5   :  { %4775 = vmatprep.subr.bf16.mxu0 %v6830_v50  ;;  %v6874_v50 = vld [vmem:[#allocation8 + $0x828] ss:$12 sps:$4 sm:$0xff]  }
 0x2a8   :  { %4776 = vmatpush1.bf16.msra.mxu0 %v6828_v52  ;;  %v6879_v52 = vld [vmem:[#allocation8 + $0x844] ss:$12 sps:$4 sm:$0xff]  }
 0x2a9   :  { %4777 = vmatprep.subr.bf16.mxu0 %v6835_v53 }
 0x2ac   :  { %4778 = vmatpush1.bf16.msra.mxu0 %v6833_v54  ;;  %v6877_v54 = vld [vmem:[#allocation8 + $0x840] ss:$12 sps:$4 sm:$0xff]  }
 0x2ad   :  { %4779 = vmatprep.subr.bf16.mxu0 %v6840_v55 }
 0x2b0   :  { %4780 = vmatpush1.bf16.msra.mxu0 %v6838_v51  ;;  %v2513_v58 = vpop.f32.mrb[24].mxu1  ;;  %v6882_v51 = vld [vmem:[#allocation8 + $0x85c] ss:$12 sps:$4 sm:$0xff]  }
 0x2b1   :  { %v5968_v17 = vadd.f32 %v2513_v58, %v439_v35  ;;  %v2515_v46 = vpop.f32.mrb[25].mxu1  ;;  %4781 = vmatprep.subr.bf16.mxu0 %v6845_v56 }
 0x2b2   :  { %v5969_v1 = vadd.f32 %v2515_v46, %v443_v57  ;;  %v2517_v4 = vpop.f32.mrb[26].mxu1  ;;  %v6883_v46 = vld [vmem:[#allocation8 + $0x870] ss:$12 sps:$4 sm:$0xff]  }
 0x2b3   :  { %v2542_v7 = vmax.f32 %v5968_v17, 0.0  ;;  %v5970_v60 = vadd.f32 %v2517_v4, %v439_v35  ;;  %v2519_v5 = vpop.f32.mrb[27].mxu1  ;;  %v6885_v17 = vld [vmem:[#allocation8 + $0x874] ss:$12 sps:$4 sm:$0xff]   ;;  %v6891_v4 = vld [vmem:[#allocation8 + $0x8a4] ss:$12 sps:$4 sm:$0xff]  }
 0x2b4   :  { %v2543_v43 = vmax.f32 %v5969_v1, 0.0  ;;  %v5971_v10 = vadd.f32 %v2519_v5, %v443_v57  ;;  %4782 = vmatpush1.bf16.msra.mxu0 %v6843_v59  ;;  %v6880_v59 = vld [vmem:[#allocation8 + $0x858] ss:$12 sps:$4 sm:$0xff]   ;;  %v6886_v1 = vld [vmem:[#allocation8 + $0x888] ss:$12 sps:$4 sm:$0xff]  }
 0x2b5   :  { %v2554_v38 = vmax.f32 %v5970_v60, 0.0  ;;  %4783 = vmatprep.subr.bf16.mxu0 %v6850_v0  ;;  %v6888_v0 = vld [vmem:[#allocation8 + $0x88c] ss:$12 sps:$4 sm:$0xff]   ;;  %v6894_v60 = vld [vmem:[#allocation8 + $0x8bc] ss:$12 sps:$4 sm:$0xff]  }
 0x2b6   :  { %v2555_v18 = vmax.f32 %v5971_v10, 0.0  ;;  %v7325_v5 = vld [vmem:[#allocation10] sm:$0x7] }
 0x2b7   :  { %v7313_v45 = vpack.c.bf16 %v2554_v38, %v2542_v7  ;;  %v6889_v7 = vld [vmem:[#allocation8 + $0x8a0] ss:$12 sps:$4 sm:$0xff]  }
 0x2b8   :  { %v2591_v14 = vpack.c.bf16 %v2555_v18, %v2543_v43  ;;  %4784 = vmatpush1.bf16.msra.mxu0 %v6848_v13  ;;  %v2523_v20 = vpop.f32.mrb[28].mxu1  ;;  %v6892_v43 = vld [vmem:[#allocation8 + $0x8b8] ss:$12 sps:$4 sm:$0xff]   ;;  %v6897_v10 = vld [vmem:[#allocation8 + $0x8d4] ss:$12 sps:$4 sm:$0xff]   ;;  %v3001_v13 = vrot.slane %v7325_v5, %v7248_v40 }
 0x2b9   :  { %v5972_v21 = vadd.f32 %v2523_v20, %v439_v35  ;;  %v2525_v22 = vpop.f32.mrb[29].mxu1  ;;  %4806 = vmatprep.subr.bf16.mxu0 %v6855_v6  ;;  %v6895_v6 = vld [vmem:[#allocation8 + $0x8d0] ss:$12 sps:$4 sm:$0xff]  }
 0x2ba   :  { %v5973_v15 = vadd.f32 %v2525_v22, %v443_v57  ;;  %v2527_v63 = vpop.f32.mrb[30].mxu1  ;;  %5136 = vmatprep.mubr.bf16.mxu1 %v2591_v14 }
 0x2bb   :  { %v2566_v24 = vmax.f32 %v5972_v21, 0.0  ;;  %v5974_v2 = vadd.f32 %v2527_v63, %v439_v35  ;;  %4786 = vmatmul.mubr.bf16.vlgmr.msra.gmra.mrb[16].mxu0 %v7275_v16  ;;  %v2529_v25 = vpop.f32.mrb[31].mxu1  ;;  %5137 = vmatmul.mubr.bf16.vlgmr.msra.gmra.mrb[72].mxu1 %v7313_v45  ;;  %v6864_v16 = vld [vmem:[#allocation8 + $0x7cc] ss:$12 sps:$4 sm:$0xff]  }
 0x2bc   :  { %v2567_v26 = vmax.f32 %v5973_v15, 0.0  ;;  %v5975_v27 = vadd.f32 %v2529_v25, %v443_v57  ;;  %4795 = vmatprep.mubr.bf16.mxu0 %v7281_v47  ;;  %4807 = vmatpush1.bf16.msra.mxu0 %v6853_v8  ;;  %v6862_v47 = vld [vmem:[#allocation8 + $0x7c8] ss:$12 sps:$4 sm:$0xff]  }
 0x2bd   :  { %v2578_v29 = vmax.f32 %v5974_v2, 0.0  ;;  %4808 = vmatprep.subr.bf16.mxu0 %v6858_v23 }
 0x2be   :  { %v2579_v11 = vmax.f32 %v5975_v27, 0.0 }
 0x2bf   :  { %v7318_v19 = vpack.c.bf16 %v2578_v29, %v2566_v24  ;;  %v6898_v24 = vld [vmem:[#allocation8 + $0x8e8] ss:$12 sps:$4 sm:$0xff]  }
 0x2c0   :  { %v7320_v31 = vpack.c.bf16 %v2579_v11, %v2567_v26  ;;  %4809 = vmatpush1.bf16.msra.mxu0 %v6856_v28 }
 0x2c1   :  { %4810 = vmatprep.subr.bf16.mxu0 %v6861_v30 }
 0x2c2   :  { %5144 = vmatprep.mubr.bf16.mxu1 %v7320_v31 }
 0x2c3   :  { %4796 = vmatmul.mubr.bf16.gmra.mrb[20].mxu0 %v7279_v42  ;;  %5145 = vmatmul.mubr.bf16.gmra.mrb[76].mxu1 %v7318_v19  ;;  %v6876_v42 = vld [vmem:[#allocation8 + $0x82c] ss:$12 sps:$4 sm:$0xff]  }
 0x2c4   :  { %4811 = vmatpush1.bf16.msra.mxu0 %v6859_v32  ;;  %4838 = vmatprep.mubr.bf16.mxu0 %v2591_v14  ;;  %v6900_v14 = vld [vmem:[#allocation8 + $0x8ec] ss:$12 sps:$4 sm:$0xff]  }
 0x2c5   :  { %4812 = vmatprep.subr.bf16.mxu0 %v6864_v16 }
 0x2c8   :  { %4813 = vmatpush1.bf16.msra.mxu0 %v6862_v47 }
 0x2c9   :  { %4814 = vmatprep.subr.bf16.mxu0 %v6867_v33 }
 0x2cc   :  { %4815 = vmatpush1.bf16.msra.mxu0 %v6865_v3 }
 0x2cd   :  { %4816 = vmatprep.subr.bf16.mxu0 %v6870_v36 }
 0x2d0   :  { %4817 = vmatpush1.bf16.msra.mxu0 %v6868_v37  ;;  %v5776_v41 = vpop.f32.mrb[32].mxu1 }
 0x2d1   :  { %v5777_v34 = vpop.f32.mrb[33].mxu1  ;;  %4818 = vmatprep.subr.bf16.mxu0 %v6873_v39 }
 0x2d2   :  { %v5778_v48 = vadd.f32 %v5777_v34, %v5776_v41  ;;  %v5779_v61 = vpop.f32.mrb[34].mxu1 }
 0x2d3   :  { %v5780_v62 = vpop.f32.mrb[35].mxu1 }
 0x2d4   :  { %4819 = vmatpush1.bf16.msra.mxu0 %v6871_v44  ;;  %v5781_v49 = vadd.f32 %v5780_v62, %v5779_v61  ;;  %v4894_v20 = vadd.f32 %v5778_v48, %v3001_v13 }
 0x2d5   :  { %4820 = vmatprep.subr.bf16.mxu0 %v6876_v42 }
 0x2d6   :  { %v4897_v23 = vadd.f32 %v5781_v49, %v3001_v13 }
 0x2d8   :  { %4821 = vmatpush1.bf16.msra.mxu0 %v6874_v50  ;;  %v5782_v53 = vpop.f32.mrb[36].mxu1 }
 0x2d9   :  { %v5783_v55 = vpop.f32.mrb[37].mxu1  ;;  %4822 = vmatprep.subr.bf16.mxu0 %v6879_v52 }
 0x2da   :  { %v5784_v35 = vadd.f32 %v5783_v55, %v5782_v53  ;;  %v5785_v56 = vpop.f32.mrb[38].mxu1 }
 0x2db   :  { %v5786_v57 = vpop.f32.mrb[39].mxu1 }
 0x2dc   :  { %4823 = vmatpush1.bf16.msra.mxu0 %v6877_v54  ;;  %v5787_v58 = vadd.f32 %v5786_v57, %v5785_v56  ;;  %v4902_v26 = vadd.f32 %v5784_v35, %v3001_v13 }
 0x2dd   :  { %4824 = vmatprep.subr.bf16.mxu0 %v6882_v51 }
 0x2de   :  { %v4905_v30 = vadd.f32 %v5787_v58, %v3001_v13 }
 0x2e0   :  { %4825 = vmatpush1.bf16.msra.mxu0 %v6880_v59 }
 0x2e1   :  { %4826 = vmatprep.subr.bf16.mxu0 %v6885_v17 }
 0x2e4   :  { %4827 = vmatpush1.bf16.msra.mxu0 %v6883_v46 }
 0x2e5   :  { %4828 = vmatprep.subr.bf16.mxu0 %v6888_v0 }
 0x2e8   :  { %4829 = vmatpush1.bf16.msra.mxu0 %v6886_v1 }
 0x2e9   :  { %4830 = vmatprep.subr.bf16.mxu0 %v6891_v4 }
 0x2ec   :  { %4831 = vmatpush1.bf16.msra.mxu0 %v6889_v7 }
 0x2ed   :  { %4832 = vmatprep.subr.bf16.mxu0 %v6894_v60 }
 0x2f0   :  { %4833 = vmatpush1.bf16.msra.mxu0 %v6892_v43  ;;  %v5804_v38 = vpop.f32.mrb[40].mxu1 }
 0x2f1   :  { %v5805_v18 = vpop.f32.mrb[41].mxu1  ;;  %4834 = vmatprep.subr.bf16.mxu0 %v6897_v10 }
 0x2f2   :  { %v5806_v8 = vadd.f32 %v5805_v18, %v5804_v38  ;;  %v5807_v21 = vpop.f32.mrb[42].mxu1 }
 0x2f3   :  { %v5808_v22 = vpop.f32.mrb[43].mxu1 }
 0x2f4   :  { %v4943_v15 = vadd.f32 %v5806_v8, %v4894_v20  ;;  %4835 = vmatpush1.bf16.msra.mxu0 %v6895_v6  ;;  %v5809_v63 = vadd.f32 %v5808_v22, %v5807_v21 }
 0x2f5   :  { %4836 = vmatprep.subr.bf16.mxu0 %v6900_v14 }
 0x2f6   :  { %v4946_v2 = vadd.f32 %v5809_v63, %v4897_v23 }
 0x2f8   :  { %4837 = vmatpush1.bf16.msra.mxu0 %v6898_v24  ;;  %v5810_v25 = vpop.f32.mrb[44].mxu1 }
 0x2f9   :  { %v5811_v40 = vpop.f32.mrb[45].mxu1 }
 0x2fa   :  { %v5812_v27 = vadd.f32 %v5811_v40, %v5810_v25  ;;  %v5813_v28 = vpop.f32.mrb[46].mxu1 }
 0x2fb   :  { %4839 = vmatmul.mubr.bf16.vlgmr.msra.gmra.mrb[16].mxu0 %v7313_v45  ;;  %v5814_v29 = vpop.f32.mrb[47].mxu1 }
 0x2fc   :  { %v4951_v11 = vadd.f32 %v5812_v27, %v4902_v26  ;;  %4848 = vmatprep.mubr.bf16.mxu0 %v7320_v31  ;;  %v5815_v32 = vadd.f32 %v5814_v29, %v5813_v28 }
 0x2fe   :  { %v4954_v16 = vadd.f32 %v5815_v32, %v4905_v30 }
 0x303   :  { %4849 = vmatmul.mubr.bf16.gmra.mrb[20].mxu0 %v7318_v19 }
 0x310   :  { %v5832_v47 = vpop.f32.mrb[48].mxu1 }
 0x311   :  { %v5833_v33 = vpop.f32.mrb[49].mxu1 }
 0x312   :  { %v5834_v3 = vadd.f32 %v5833_v33, %v5832_v47  ;;  %v5835_v36 = vpop.f32.mrb[50].mxu1 }
 0x313   :  { %v5836_v37 = vpop.f32.mrb[51].mxu1 }
 0x314   :  { %v4992_v39 = vadd.f32 %v5834_v3, %v4943_v15  ;;  %v5837_v41 = vadd.f32 %v5836_v37, %v5835_v36  ;;  %v2993_v36 = vrot.slane %v7325_v5, %v7206_v9  ;;  %v2997_v37 = vrot.slane %v7325_v5, %v7209_v12 }
 0x316   :  { %v4995_v44 = vadd.f32 %v5837_v41, %v4946_v2 }
 0x318   :  { %v5838_v34 = vpop.f32.mrb[52].mxu1 }
 0x319   :  { %v5839_v42 = vpop.f32.mrb[53].mxu1 }
 0x31a   :  { %v5840_v45 = vadd.f32 %v5839_v42, %v5838_v34  ;;  %v5841_v48 = vpop.f32.mrb[54].mxu1 }
 0x31b   :  { %v5842_v61 = vpop.f32.mrb[55].mxu1 }
 0x31c   :  { %v5000_v62 = vadd.f32 %v5840_v45, %v4951_v11  ;;  %v5843_v49 = vadd.f32 %v5842_v61, %v5841_v48 }
 0x31e   :  { %v5003_v31 = vadd.f32 %v5843_v49, %v4954_v16 }
 0x330   :  { %v5860_v50 = vpop.f32.mrb[56].mxu1 }
 0x331   :  { %v5861_v52 = vpop.f32.mrb[57].mxu1 }
 0x332   :  { %v5862_v53 = vadd.f32 %v5861_v52, %v5860_v50  ;;  %v5863_v19 = vpop.f32.mrb[58].mxu1 }
 0x333   :  { %v5864_v54 = vpop.f32.mrb[59].mxu1 }
 0x334   :  { %v5041_v55 = vadd.f32 %v5862_v53, %v4992_v39  ;;  %v5865_v51 = vadd.f32 %v5864_v54, %v5863_v19 }
 0x336   :  { %v5044_v35 = vadd.f32 %v5865_v51, %v4995_v44 }
 0x338   :  { %v5866_v56 = vpop.f32.mrb[60].mxu1 }
 0x339   :  { %v5867_v57 = vpop.f32.mrb[61].mxu1 }
 0x33a   :  { %v5868_v58 = vadd.f32 %v5867_v57, %v5866_v56  ;;  %v5869_v59 = vpop.f32.mrb[62].mxu1 }
 0x33b   :  { %v5870_v17 = vpop.f32.mrb[63].mxu1 }
 0x33c   :  { %v5049_v46 = vadd.f32 %v5868_v58, %v5000_v62  ;;  %v5871_v0 = vadd.f32 %v5870_v17, %v5869_v59 }
 0x33e   :  { %v5052_v1 = vadd.f32 %v5871_v0, %v5003_v31 }
 0x350   :  { %v5888_v4 = vpop.f32.mrb[64].mxu1 }
 0x351   :  { %v5889_v7 = vpop.f32.mrb[65].mxu1 }
 0x352   :  { %v5890_v60 = vadd.f32 %v5889_v7, %v5888_v4  ;;  %v5891_v43 = vpop.f32.mrb[66].mxu1 }
 0x353   :  { %v5892_v10 = vpop.f32.mrb[67].mxu1 }
 0x354   :  { %v5090_v13 = vadd.f32 %v5890_v60, %v5041_v55  ;;  %v5893_v38 = vadd.f32 %v5892_v10, %v5891_v43 }
 0x356   :  { %v5093_v6 = vadd.f32 %v5893_v38, %v5044_v35 }
 0x358   :  { %v5894_v18 = vpop.f32.mrb[68].mxu1 }
 0x359   :  { %v5895_v14 = vpop.f32.mrb[69].mxu1 }
 0x35a   :  { %v5896_v20 = vadd.f32 %v5895_v14, %v5894_v18  ;;  %v5897_v8 = vpop.f32.mrb[70].mxu1 }
 0x35b   :  { %v5898_v21 = vpop.f32.mrb[71].mxu1 }
 0x35c   :  { %v5098_v22 = vadd.f32 %v5896_v20, %v5049_v46  ;;  %v5899_v23 = vadd.f32 %v5898_v21, %v5897_v8 }
 0x35e   :  { %v5101_v15 = vadd.f32 %v5899_v23, %v5052_v1 }
 0x38e   :  { %v5916_v63 = vpop.f32.mrb[72].mxu1 }
 0x38f   :  { %v5917_v24 = vpop.f32.mrb[73].mxu1 }
 0x390   :  { %v5918_v2 = vadd.f32 %v5917_v24, %v5916_v63  ;;  %v5919_v25 = vpop.f32.mrb[74].mxu1 }
 0x391   :  { %v5920_v40 = vpop.f32.mrb[75].mxu1 }
 0x392   :  { %v5139_v26 = vadd.f32 %v5918_v2, %v5090_v13  ;;  %v5921_v27 = vadd.f32 %v5920_v40, %v5919_v25 }
 0x394   :  { %5155 = vst [vmem:[#allocation11 + $0x10] sm:$0xff] %v5139_v26  ;;  %v5142_v28 = vadd.f32 %v5921_v27, %v5093_v6 }
 0x396   :  { %5158 = vst [vmem:[#allocation11 + $0x28] sm:$0xff] %v5142_v28  ;;  %v5922_v29 = vpop.f32.mrb[76].mxu1 }
 0x397   :  { %v5923_v30 = vpop.f32.mrb[77].mxu1 }
 0x398   :  { %v5924_v11 = vadd.f32 %v5923_v30, %v5922_v29  ;;  %v5925_v32 = vpop.f32.mrb[78].mxu1 }
 0x399   :  { %v5926_v16 = vpop.f32.mrb[79].mxu1 }
 0x39a   :  { %v5147_v47 = vadd.f32 %v5924_v11, %v5098_v22  ;;  %v5927_v33 = vadd.f32 %v5926_v16, %v5925_v32 }
 0x39c   :  { %5161 = vst [vmem:[#allocation11 + $0x40] sm:$0xff] %v5147_v47  ;;  %v5150_v3 = vadd.f32 %v5927_v33, %v5101_v15 }
 0x39e   :  { %5164 = vst [vmem:[#allocation11 + $0x58] sm:$0xff] %v5150_v3 }
 0x3ce   :  { %v4840_v39 = vpop.f32.mrb[16].mxu0 }
 0x3cf   :  { %v5976_v41 = vadd.f32 %v4840_v39, %v2993_v36  ;;  %v4842_v44 = vpop.f32.mrb[17].mxu0 }
 0x3d0   :  { %v5977_v34 = vadd.f32 %v4842_v44, %v2997_v37  ;;  %v4844_v42 = vpop.f32.mrb[18].mxu0 }
 0x3d1   :  { %5153 = vst [vmem:[#allocation11] sm:$0xff] %v5976_v41  ;;  %v5978_v45 = vadd.f32 %v4844_v42, %v2993_v36  ;;  %v4846_v48 = vpop.f32.mrb[19].mxu0 }
 0x3d2   :  { %5154 = vst [vmem:[#allocation11 + $0x8] sm:$0xff] %v5977_v34  ;;  %v5979_v61 = vadd.f32 %v4846_v48, %v2997_v37 }
 0x3d3   :  { %5156 = vst [vmem:[#allocation11 + $0x18] sm:$0xff] %v5978_v45 }
 0x3d4   :  { %5157 = vst [vmem:[#allocation11 + $0x20] sm:$0xff] %v5979_v61 }
 0x3d6   :  { %v4850_v62 = vpop.f32.mrb[20].mxu0 }
 0x3d7   :  { %v5980_v49 = vadd.f32 %v4850_v62, %v2993_v36  ;;  %v4852_v31 = vpop.f32.mrb[21].mxu0 }
 0x3d8   :  { %v5981_v9 = vadd.f32 %v4852_v31, %v2997_v37  ;;  %v4854_v50 = vpop.f32.mrb[22].mxu0 }
 0x3d9   :  { %5159 = vst [vmem:[#allocation11 + $0x30] sm:$0xff] %v5980_v49  ;;  %v5982_v12 = vadd.f32 %v4854_v50, %v2993_v36  ;;  %v4856_v5 = vpop.f32.mrb[23].mxu0 }
 0x3da   :  { %5160 = vst [vmem:[#allocation11 + $0x38] sm:$0xff] %v5981_v9  ;;  %v5983_v52 = vadd.f32 %v4856_v5, %v2997_v37 }
 0x3db   :  { %5162 = vst [vmem:[#allocation11 + $0x48] sm:$0xff] %v5982_v12 }
 0x3dc   :  { %5163 = vst [vmem:[#allocation11 + $0x50] sm:$0xff] %v5983_v52 }
 0x3dd   :  { %7023 = shalt.err (!%p7020_p2)
}
 0x3de   :  { %s7024_s10 = scalar_lea.hbm %s7356_s5, 1536 }
 0x3df   :  { %p7025_p3 = scmp.ne.s32.totalorder %s7356_s5, %s7024_s10  ;;  %p7028_p4 = scmp.lt.u32.totalorder %s7024_s10, %s7356_s5 }
 0x3e1   :  { %p7030_p5 = pnand %p7028_p4, %p7025_p3 }
 0x3e3   :  { %7033 = shalt.err (!%p7030_p5)
}
 0x3e4   :  { %5176 = dma.vmem_to_hbm [thread:$0]  %s5171_s6, 1536, %s7356_s5, [#allocation4], %s7049_s3, %s7049_s3, %s7050_s30  }
 0x3e5   :  { %7040 = dma.done.wait [#allocation4], 1536  }
 0x3e6   :  { %7041 = vsyncadd [#allocation4], 4294965760 }
 0x3e7   :  { %5180 = vsyncpa [#allocation3], 1 }
 0x3e8   :  { %5181 = vsyncpa [#allocation6], 1 }
 0x3e9   :  { %5182 = vsyncpa [#allocation9], 1 }
 0x3ea   :  { %5183 = vsyncpa [#allocation4], 1 }

</bundles_post_ra>
